<compile_context>
chip_gen: v7x
topology: tpu7x:2x2x1
jax: 0.10.0
libtpu: 0.0.40
codegen_flags: <defaults>
</compile_context>

<pallas_src>
import jax
import jax.numpy as jnp
from jax.experimental import pallas as pl
from jax.experimental.pallas import tpu as pltpu

F32 = jnp.float32
BF16 = jnp.bfloat16
LANE = 128  # lane-dense presentation width for the 16-wide hidden dim

_N_LAYER_W = 12  # wn, bn, we, be, wm1, bm1, wm2, bm2, wu1, bu1, wu2, bu2


def _vmem_spec():
    return pl.BlockSpec(memory_space=pltpu.MemorySpace.VMEM)


# ---------------------------------------------------------------------------
# Fused kernel: structure prologue -> conv1 -> conv2 -> global_mean_pool -> fc
# ---------------------------------------------------------------------------
def _gnn_layer(h_in_bf, ea_bf, as_bf, w_refs):
    """One GNNLayer + the outer F.relu; hidden dim presented as LANE lanes.

    Weights are loaded from refs at their point of use (bf16); all matmuls are
    bf16 x bf16 with f32 accumulation; biases are f32.
    """
    wn, bn, we, be, wm1, bm1, wm2, bm2, wu1, bu1, wu2, bu2 = w_refs
    # node_transform / edge_transform
    h = jnp.dot(h_in_bf, wn[...], preferred_element_type=F32) + bn[...]      # (N, LANE)
    e = jnp.dot(ea_bf, we[...], preferred_element_type=F32) + be[...]        # (E, LANE)
    # edge_mlp: Linear -> ReLU -> Linear
    t = jnp.maximum(
        jnp.dot(e.astype(BF16), wm1[...], preferred_element_type=F32) + bm1[...], 0.0)
    msg = jnp.dot(t.astype(BF16), wm2[...], preferred_element_type=F32) + bm2[...]
    # message(x_j + edge_msg) + aggr='add' as ONE structure matmul:
    #   aggr = [A | S] @ [h ; msg]   (bf16 operands, f32 MXU accumulation)
    hm = jnp.concatenate([h.astype(BF16), msg.astype(BF16)], axis=0)         # (N+E, LANE)
    aggr = jnp.dot(as_bf, hm, preferred_element_type=F32)                    # (N, LANE)
    # update(): update_mlp(cat([x, aggr], dim=1)) as ONE lane-concatenated K=2*LANE matmul
    # (wu1 halves pre-placed at row offsets 0 and LANE).
    cat = jnp.concatenate([h, aggr], axis=1).astype(BF16)                    # (N, 2*LANE)
    u = jnp.maximum(
        jnp.dot(cat, wu1[...], preferred_element_type=F32) + bu1[...], 0.0)
    out = jnp.dot(u.astype(BF16), wu2[...], preferred_element_type=F32) + bu2[...]
    return jnp.maximum(out, 0.0)   # F.relu from GNNModel.forward, fused here


def gnn_model_kernel(src_ref, dst_ref, batch_ref, x_ref, ea_ref, *rest):
    w1 = rest[:_N_LAYER_W]
    w2 = rest[_N_LAYER_W:2 * _N_LAYER_W]
    fcw_ref, fcb_ref, out_ref = rest[2 * _N_LAYER_W:]

    E = src_ref.shape[0]
    N = x_ref.shape[0]
    G = out_ref.shape[0]

    # ---- structure prologue (built once, shared by conv1 and conv2, all bf16) ----
    src = src_ref[...]                                                   # (E, 1)
    dst = dst_ref[...]                                                   # (1, E)
    bat = batch_ref[...]                                                 # (1, N)
    oh_src = (jax.lax.broadcasted_iota(jnp.int32, (E, N), 1) == src).astype(BF16)  # (E,N)
    s_mat = (jax.lax.broadcasted_iota(jnp.int32, (N, E), 0) == dst).astype(BF16)   # (N,E)
    # A[i,j] = #edges j->i : bf16 operands, f32 accumulation (exact for counts <= 256).
    a = jnp.dot(s_mat, oh_src, preferred_element_type=F32)               # (N, N)
    as_bf = jnp.concatenate([a.astype(BF16), s_mat], axis=1)             # (N, N+E) bf16
    # global_mean_pool matrix with the zero-guarded reciprocal folded in.
    p = (jax.lax.broadcasted_iota(jnp.int32, (G, N), 0) == bat).astype(F32)
    cnt = jnp.sum(p, axis=1, keepdims=True)
    p_bf = (p * jnp.where(cnt > 0.0, 1.0 / jnp.maximum(cnt, 1.0), 0.0)).astype(BF16)

    ea = ea_ref[...]                                                     # (E, Fe) bf16
    h = _gnn_layer(x_ref[...], ea, as_bf, w1)
    # TODO(synk): Dropout(0.5) is identity in eval/inference mode; training-mode dropout
    # (pltpu.prng_seed + pltpu.prng_random_bits mask) is not implemented.
    h = _gnn_layer(h.astype(BF16), ea, as_bf, w2)

    # global_mean_pool (reciprocal pre-folded into p_bf) + fc, all still in VMEM.
    pooled = jnp.dot(p_bf, h.astype(BF16), preferred_element_type=F32)   # (G, LANE)
    out_ref[...] = (jnp.dot(pooled.astype(BF16), fcw_ref[...],
                            preferred_element_type=F32) + fcb_ref[...])


# ---------------------------------------------------------------------------
# Weight prep (one-time, init-side): lane-pad the 16-wide hidden dim to 128
# and pre-cast matmul weights to bf16 (biases stay f32).
# ---------------------------------------------------------------------------
def _pad(w, rows, cols, dtype=BF16):
    out = jnp.zeros((rows, cols), F32).at[: w.shape[0], : w.shape[1]].set(w.astype(F32))
    return out.astype(dtype)


def pad_layer_params(p, node_in_padded):
    c = p["wn"].shape[1]
    wn_rows = LANE if node_in_padded else p["wn"].shape[0]
    # merged update_mlp first Linear: [h | aggr] halves at row offsets 0 and LANE
    wu1 = jnp.zeros((2 * LANE, LANE), F32)
    wu1 = wu1.at[:c, :c].set(p["wu1"][:c].astype(F32))
    wu1 = wu1.at[LANE:LANE + c, :c].set(p["wu1"][c:].astype(F32))
    return (_pad(p["wn"], wn_rows, LANE), _pad(p["bn"], 1, LANE, F32),
            _pad(p["we"], p["we"].shape[0], LANE), _pad(p["be"], 1, LANE, F32),
            _pad(p["wm1"], LANE, LANE), _pad(p["bm1"], 1, LANE, F32),
            _pad(p["wm2"], LANE, LANE), _pad(p["bm2"], 1, LANE, F32),
            wu1.astype(BF16), _pad(p["bu1"], 1, LANE, F32),
            _pad(p["wu2"], LANE, LANE), _pad(p["bu2"], 1, LANE, F32))


def prepare_padded_params(params):
    w1 = pad_layer_params(params["conv1"], node_in_padded=False)
    w2 = pad_layer_params(params["conv2"], node_in_padded=True)
    fcw = _pad(params["fc_w"], LANE, params["fc_w"].shape[1])            # bf16
    fcb = params["fc_b"].astype(F32)
    return (*w1, *w2, fcw, fcb)


# ---------------------------------------------------------------------------
# Full model forward (single fused pallas_call).
# ---------------------------------------------------------------------------
def _estimate_vmem_bytes(N, E, G, padded_weights):
    w_bytes = sum(int(a.size) * a.dtype.itemsize for a in padded_weights)
    struct_bytes = 2 * N * (N + E) + 4 * N * N + 2 * G * N      # bf16 [A|S], f32 A temp, bf16 P
    act_bytes = 4 * LANE * (8 * N + 4 * E) + 4 * G * (LANE + 1)  # f32 intermediates
    est = 4 * (w_bytes + struct_bytes + act_bytes) + (8 << 20)   # generous headroom
    # Clamp above the default scoped limit and below v7x's 64 MiB physical VMEM.
    return int(min(max(est, 32 << 20), 60 << 20))


def gnn_model_forward(x, edge_index, edge_attr, batch, padded_weights, num_graphs):
    N = x.shape[0]
    E = edge_index.shape[1]
    src = edge_index[0].reshape(E, 1).astype(jnp.int32)
    dst = edge_index[1].reshape(1, E).astype(jnp.int32)
    bat = batch.reshape(1, N).astype(jnp.int32)
    out_features = padded_weights[-2].shape[1]

    args = (src, dst, bat, x.astype(BF16), edge_attr.astype(BF16), *padded_weights)
    # Single fused pallas_call: structure -> conv1 -> (dropout) -> conv2 -> (dropout)
    # -> global_mean_pool -> fc, with node activations resident in VMEM throughout.
    # TODO(synk): for large graphs (bf16 [A|S] no longer fits ~60 MiB VMEM, earliest on
    # v7x), switch to a row-tiled ("parallel","arbitrary") grid over A's blocks or a
    # PrefetchScalarGridSpec / DMA-gather formulation over dst-sorted edges instead of
    # densifying to O(N^2); at small/medium sizes this single fused invocation is fastest.
    return pl.pallas_call(
        gnn_model_kernel,
        out_shape=jax.ShapeDtypeStruct((num_graphs, out_features), F32),
        in_specs=[_vmem_spec()] * len(args),
        out_specs=_vmem_spec(),
        compiler_params=pltpu.CompilerParams(
            vmem_limit_bytes=_estimate_vmem_bytes(N, E, num_graphs, padded_weights)),
    )(*args)


# ---------------------------------------------------------------------------
# Deterministic parameter init (PyTorch Linear-style uniform bounds).
# ---------------------------------------------------------------------------
def init_linear(key, fan_in, fan_out):
    kw, kb = jax.random.split(key)
    bound = 1.0 / jnp.sqrt(jnp.float32(fan_in))
    w = jax.random.uniform(kw, (fan_in, fan_out), F32, -bound, bound)
    b = jax.random.uniform(kb, (1, fan_out), F32, -bound, bound)
    return w, b


def init_gnn_layer(key, node_in, node_out, edge_in, edge_out):
    ks = jax.random.split(key, 6)
    wn, bn = init_linear(ks[0], node_in, node_out)
    we, be = init_linear(ks[1], edge_in, edge_out)
    wm1, bm1 = init_linear(ks[2], edge_out, node_out)
    wm2, bm2 = init_linear(ks[3], node_out, node_out)
    wu1, bu1 = init_linear(ks[4], 2 * node_out, node_out)
    wu2, bu2 = init_linear(ks[5], node_out, node_out)
    return dict(wn=wn, bn=bn, we=we, be=be, wm1=wm1, bm1=bm1, wm2=wm2, bm2=bm2,
                wu1=wu1, bu1=bu1, wu2=wu2, bu2=bu2)


# ---------------------------------------------------------------------------
# Pure-JAX references.
# ---------------------------------------------------------------------------
def ref_layer_f32(x, ea, src, dst, p):
    h = x @ p["wn"] + p["bn"]
    e = ea @ p["we"] + p["be"]
    t = jnp.maximum(e @ p["wm1"] + p["bm1"], 0.0) @ p["wm2"] + p["bm2"]
    msg = h[src] + t
    aggr = jax.ops.segment_sum(msg, dst, num_segments=x.shape[0])
    u = jnp.maximum(jnp.concatenate([h, aggr], axis=1) @ p["wu1"] + p["bu1"], 0.0)
    return jnp.maximum(u @ p["wu2"] + p["bu2"], 0.0)


def ref_model_f32(x, edge_index, edge_attr, batch, params, num_graphs):
    """Pure f32 PyTorch-semantics reference."""
    src, dst = edge_index[0], edge_index[1]
    h = ref_layer_f32(x, edge_attr, src, dst, params["conv1"])
    h = ref_layer_f32(h, edge_attr, src, dst, params["conv2"])
    oh = jax.nn.one_hot(batch, num_graphs, dtype=F32)
    pooled = (oh.T @ h) / jnp.maximum(jnp.sum(oh, axis=0)[:, None], 1.0)
    return pooled @ params["fc_w"] + params["fc_b"]


def ref_model_matched(x, edge_index, edge_attr, batch, params, num_graphs):
    """Same numerics as the kernel: bf16 operands everywhere, f32 accumulation."""
    src, dst = edge_index[0], edge_index[1]
    N = x.shape[0]
    oh_src = jax.nn.one_hot(src, N, dtype=BF16)                 # (E, N)
    S = jax.nn.one_hot(dst, N, dtype=BF16).T                    # (N, E)
    A = jnp.dot(S, oh_src, preferred_element_type=F32)          # (N, N)
    AS = jnp.concatenate([A.astype(BF16), S], axis=1)           # (N, N+E)
    P = jax.nn.one_hot(batch, num_graphs, dtype=F32).T          # (G, N)
    cnt = jnp.sum(P, axis=1, keepdims=True)
    P_bf = (P * jnp.where(cnt > 0.0, 1.0 / jnp.maximum(cnt, 1.0), 0.0)).astype(BF16)
    ea_bf = edge_attr.astype(BF16)

    def layer(h_in_bf, p):
        h = jnp.dot(h_in_bf, p["wn"].astype(BF16), preferred_element_type=F32) + p["bn"]
        e = jnp.dot(ea_bf, p["we"].astype(BF16), preferred_element_type=F32) + p["be"]
        t = jnp.maximum(jnp.dot(e.astype(BF16), p["wm1"].astype(BF16),
                                preferred_element_type=F32) + p["bm1"], 0.0)
        msg = jnp.dot(t.astype(BF16), p["wm2"].astype(BF16),
                      preferred_element_type=F32) + p["bm2"]
        hm = jnp.concatenate([h.astype(BF16), msg.astype(BF16)], axis=0)
        aggr = jnp.dot(AS, hm, preferred_element_type=F32)
        cat = jnp.concatenate([h, aggr], axis=1).astype(BF16)
        u = jnp.maximum(jnp.dot(cat, p["wu1"].astype(BF16),
                                preferred_element_type=F32) + p["bu1"], 0.0)
        out = jnp.dot(u.astype(BF16), p["wu2"].astype(BF16),
                      preferred_element_type=F32) + p["bu2"]
        return jnp.maximum(out, 0.0)

    h = layer(x.astype(BF16), params["conv1"])
    h = layer(h.astype(BF16), params["conv2"])
    pooled = jnp.dot(P_bf, h.astype(BF16), preferred_element_type=F32)
    return (jnp.dot(pooled.astype(BF16), params["fc_w"].astype(BF16),
                    preferred_element_type=F32) + params["fc_b"])


if __name__ == "__main__":
    key = jax.random.PRNGKey(0)
    k_x, k_ea, k_ei, k_c1, k_c2, k_fc = jax.random.split(key, 6)

    # small graph batch: 8 nodes, 16 edges, node/edge feature size 4, 2 graphs
    N, E, F_NODE, F_EDGE, G = 8, 16, 4, 4, 2
    x = jax.random.normal(k_x, (N, F_NODE), F32)
    edge_attr = jax.random.normal(k_ea, (E, F_EDGE), F32)
    edge_index = jax.random.randint(k_ei, (2, E), 0, N, jnp.int32)     # [src; dst]
    batch = jnp.array([0, 0, 0, 0, 1, 1, 1, 1], jnp.int32)

    params = {
        "conv1": init_gnn_layer(k_c1, F_NODE, 16, F_EDGE, 16),
        "conv2": init_gnn_layer(k_c2, 16, 16, F_EDGE, 16),
    }
    params["fc_w"], params["fc_b"] = init_linear(k_fc, 16, 1)

    padded = prepare_padded_params(params)   # one-time lane-padding + bf16 weight prep

    out = gnn_model_forward(x, edge_index, edge_attr, batch, padded, G)
    out = jax.block_until_ready(out)
    assert out.shape == (G, 1)

    # (1) strict check vs. a reference with identical numerics (bf16 ops, f32 acc)
    ref_bf = ref_model_matched(x, edge_index, edge_attr, batch, params, G)
    assert jnp.allclose(out, ref_bf, atol=5e-3, rtol=5e-3), (out, ref_bf)

    # (2) envelope check vs. pure-f32 module semantics (difference = bf16 rounding only)
    ref_f = ref_model_f32(x, edge_index, edge_attr, batch, params, G)
    assert jnp.allclose(out, ref_f, atol=5e-2, rtol=5e-2), (out, ref_f)

    print("KERNEL_OK")
</pallas_src>

<mosaic_0001>
module attributes {stable_mosaic.version = 11 : i64} {
  func.func @gnn_model_kernel(%arg0: memref<16x1xi32, #tpu.memory_space<vmem>>, %arg1: memref<1x16xi32, #tpu.memory_space<vmem>>, %arg2: memref<1x8xi32, #tpu.memory_space<vmem>>, %arg3: memref<8x4xbf16, #tpu.memory_space<vmem>>, %arg4: memref<16x4xbf16, #tpu.memory_space<vmem>>, %arg5: memref<4x128xbf16, #tpu.memory_space<vmem>>, %arg6: memref<1x128xf32, #tpu.memory_space<vmem>>, %arg7: memref<4x128xbf16, #tpu.memory_space<vmem>>, %arg8: memref<1x128xf32, #tpu.memory_space<vmem>>, %arg9: memref<128x128xbf16, #tpu.memory_space<vmem>>, %arg10: memref<1x128xf32, #tpu.memory_space<vmem>>, %arg11: memref<128x128xbf16, #tpu.memory_space<vmem>>, %arg12: memref<1x128xf32, #tpu.memory_space<vmem>>, %arg13: memref<256x128xbf16, #tpu.memory_space<vmem>>, %arg14: memref<1x128xf32, #tpu.memory_space<vmem>>, %arg15: memref<128x128xbf16, #tpu.memory_space<vmem>>, %arg16: memref<1x128xf32, #tpu.memory_space<vmem>>, %arg17: memref<128x128xbf16, #tpu.memory_space<vmem>>, %arg18: memref<1x128xf32, #tpu.memory_space<vmem>>, %arg19: memref<4x128xbf16, #tpu.memory_space<vmem>>, %arg20: memref<1x128xf32, #tpu.memory_space<vmem>>, %arg21: memref<128x128xbf16, #tpu.memory_space<vmem>>, %arg22: memref<1x128xf32, #tpu.memory_space<vmem>>, %arg23: memref<128x128xbf16, #tpu.memory_space<vmem>>, %arg24: memref<1x128xf32, #tpu.memory_space<vmem>>, %arg25: memref<256x128xbf16, #tpu.memory_space<vmem>>, %arg26: memref<1x128xf32, #tpu.memory_space<vmem>>, %arg27: memref<128x128xbf16, #tpu.memory_space<vmem>>, %arg28: memref<1x128xf32, #tpu.memory_space<vmem>>, %arg29: memref<128x1xbf16, #tpu.memory_space<vmem>>, %arg30: memref<1x1xf32, #tpu.memory_space<vmem>>, %arg31: memref<2x1xf32, #tpu.memory_space<vmem>>) attributes {dimension_semantics = [], scalar_prefetch = 0 : i64, scratch_operands = 0 : i64, tpu.core_type = #tpu.core_type<tc>} {
    %c0 = arith.constant 0 : index
    %c0_0 = arith.constant 0 : index
    %0 = vector.load %arg0[%c0, %c0_0] : memref<16x1xi32, #tpu.memory_space<vmem>>, vector<16x1xi32>
    %c0_1 = arith.constant 0 : index
    %c0_2 = arith.constant 0 : index
    %1 = vector.load %arg1[%c0_1, %c0_2] : memref<1x16xi32, #tpu.memory_space<vmem>>, vector<1x16xi32>
    %c0_3 = arith.constant 0 : index
    %c0_4 = arith.constant 0 : index
    %2 = vector.load %arg2[%c0_3, %c0_4] : memref<1x8xi32, #tpu.memory_space<vmem>>, vector<1x8xi32>
    %3 = tpu.iota {dimensions = array<i32: 1>} : vector<16x8xi32>
    %4 = vector.broadcast %0 : vector<16x1xi32> to vector<16x8xi32>
    %5 = arith.cmpi eq, %3, %4 : vector<16x8xi32>
    %6 = arith.extui %5 : vector<16x8xi1> to vector<16x8xi32>
    %7 = arith.sitofp %6 : vector<16x8xi32> to vector<16x8xf32>
    %8 = arith.truncf %7 : vector<16x8xf32> to vector<16x8xbf16>
    %9 = tpu.iota {dimensions = array<i32: 0>} : vector<8x16xi32>
    %10 = vector.broadcast %1 : vector<1x16xi32> to vector<8x16xi32>
    %11 = arith.cmpi eq, %9, %10 : vector<8x16xi32>
    %12 = arith.extui %11 : vector<8x16xi1> to vector<8x16xi32>
    %13 = arith.sitofp %12 : vector<8x16xi32> to vector<8x16xf32>
    %14 = arith.truncf %13 : vector<8x16xf32> to vector<8x16xbf16>
    %cst = arith.constant dense<0.000000e+00> : vector<8x8xf32>
    %15 = tpu.matmul %14, %8, %cst {dimension_numbers = #tpu.dot_dimension_numbers<[1], [0], [0], [1], [0, 0, 1, 1], [], []>} : vector<8x16xbf16>, vector<16x8xbf16>, vector<8x8xf32> -> vector<8x8xf32>
    %16 = arith.truncf %15 : vector<8x8xf32> to vector<8x8xbf16>
    %17 = tpu.concatenate %16, %14 in 1 : vector<8x8xbf16>, vector<8x16xbf16> -> vector<8x24xbf16>
    %18 = tpu.iota {dimensions = array<i32: 0>} : vector<2x8xi32>
    %19 = vector.broadcast %2 : vector<1x8xi32> to vector<2x8xi32>
    %20 = arith.cmpi eq, %18, %19 : vector<2x8xi32>
    %21 = arith.extui %20 : vector<2x8xi1> to vector<2x8xi32>
    %22 = arith.sitofp %21 : vector<2x8xi32> to vector<2x8xf32>
    %cst_5 = arith.constant dense<0.000000e+00> : vector<2xf32>
    %23 = vector.multi_reduction <add>, %22, %cst_5 [1] : vector<2x8xf32> to vector<2xf32>
    %24 = vector.shape_cast %23 : vector<2xf32> to vector<2x1xf32>
    %cst_6 = arith.constant 0.000000e+00 : f32
    %25 = vector.broadcast %cst_6 : f32 to vector<2x1xf32>
    %26 = arith.cmpf ogt, %24, %25 : vector<2x1xf32>
    %cst_7 = arith.constant 1.000000e+00 : f32
    %27 = vector.broadcast %cst_7 : f32 to vector<2x1xf32>
    %28 = arith.maximumf %24, %27 : vector<2x1xf32>
    %cst_8 = arith.constant 1.000000e+00 : f32
    %29 = vector.broadcast %cst_8 : f32 to vector<2x1xf32>
    %30 = arith.divf %29, %28 : vector<2x1xf32>
    %cst_9 = arith.constant 0.000000e+00 : f32
    %31 = vector.broadcast %cst_9 : f32 to vector<2x1xf32>
    %32 = arith.select %26, %30, %31 : vector<2x1xi1>, vector<2x1xf32>
    %33 = vector.broadcast %32 : vector<2x1xf32> to vector<2x8xf32>
    %34 = arith.mulf %22, %33 : vector<2x8xf32>
    %35 = arith.truncf %34 : vector<2x8xf32> to vector<2x8xbf16>
    %c0_10 = arith.constant 0 : index
    %c0_11 = arith.constant 0 : index
    %36 = vector.load %arg4[%c0_10, %c0_11] : memref<16x4xbf16, #tpu.memory_space<vmem>>, vector<16x4xbf16>
    %c0_12 = arith.constant 0 : index
    %c0_13 = arith.constant 0 : index
    %37 = vector.load %arg3[%c0_12, %c0_13] : memref<8x4xbf16, #tpu.memory_space<vmem>>, vector<8x4xbf16>
    %c0_14 = arith.constant 0 : index
    %c0_15 = arith.constant 0 : index
    %38 = vector.load %arg5[%c0_14, %c0_15] : memref<4x128xbf16, #tpu.memory_space<vmem>>, vector<4x128xbf16>
    %cst_16 = arith.constant dense<0.000000e+00> : vector<8x128xf32>
    %39 = tpu.matmul %37, %38, %cst_16 {dimension_numbers = #tpu.dot_dimension_numbers<[1], [0], [0], [1], [0, 0, 1, 1], [], []>} : vector<8x4xbf16>, vector<4x128xbf16>, vector<8x128xf32> -> vector<8x128xf32>
    %c0_17 = arith.constant 0 : index
    %c0_18 = arith.constant 0 : index
    %40 = vector.load %arg6[%c0_17, %c0_18] : memref<1x128xf32, #tpu.memory_space<vmem>>, vector<1x128xf32>
    %41 = vector.broadcast %40 : vector<1x128xf32> to vector<8x128xf32>
    %42 = arith.addf %39, %41 : vector<8x128xf32>
    %c0_19 = arith.constant 0 : index
    %c0_20 = arith.constant 0 : index
    %43 = vector.load %arg7[%c0_19, %c0_20] : memref<4x128xbf16, #tpu.memory_space<vmem>>, vector<4x128xbf16>
    %cst_21 = arith.constant dense<0.000000e+00> : vector<16x128xf32>
    %44 = tpu.matmul %36, %43, %cst_21 {dimension_numbers = #tpu.dot_dimension_numbers<[1], [0], [0], [1], [0, 0, 1, 1], [], []>} : vector<16x4xbf16>, vector<4x128xbf16>, vector<16x128xf32> -> vector<16x128xf32>
    %c0_22 = arith.constant 0 : index
    %c0_23 = arith.constant 0 : index
    %45 = vector.load %arg8[%c0_22, %c0_23] : memref<1x128xf32, #tpu.memory_space<vmem>>, vector<1x128xf32>
    %46 = vector.broadcast %45 : vector<1x128xf32> to vector<16x128xf32>
    %47 = arith.addf %44, %46 : vector<16x128xf32>
    %48 = arith.truncf %47 : vector<16x128xf32> to vector<16x128xbf16>
    %c0_24 = arith.constant 0 : index
    %c0_25 = arith.constant 0 : index
    %49 = vector.load %arg9[%c0_24, %c0_25] : memref<128x128xbf16, #tpu.memory_space<vmem>>, vector<128x128xbf16>
    %cst_26 = arith.constant dense<0.000000e+00> : vector<16x128xf32>
    %50 = tpu.matmul %48, %49, %cst_26 {dimension_numbers = #tpu.dot_dimension_numbers<[1], [0], [0], [1], [0, 0, 1, 1], [], []>} : vector<16x128xbf16>, vector<128x128xbf16>, vector<16x128xf32> -> vector<16x128xf32>
    %c0_27 = arith.constant 0 : index
    %c0_28 = arith.constant 0 : index
    %51 = vector.load %arg10[%c0_27, %c0_28] : memref<1x128xf32, #tpu.memory_space<vmem>>, vector<1x128xf32>
    %52 = vector.broadcast %51 : vector<1x128xf32> to vector<16x128xf32>
    %53 = arith.addf %50, %52 : vector<16x128xf32>
    %cst_29 = arith.constant 0.000000e+00 : f32
    %54 = vector.broadcast %cst_29 : f32 to vector<16x128xf32>
    %55 = arith.maximumf %53, %54 : vector<16x128xf32>
    %56 = arith.truncf %55 : vector<16x128xf32> to vector<16x128xbf16>
    %c0_30 = arith.constant 0 : index
    %c0_31 = arith.constant 0 : index
    %57 = vector.load %arg11[%c0_30, %c0_31] : memref<128x128xbf16, #tpu.memory_space<vmem>>, vector<128x128xbf16>
    %cst_32 = arith.constant dense<0.000000e+00> : vector<16x128xf32>
    %58 = tpu.matmul %56, %57, %cst_32 {dimension_numbers = #tpu.dot_dimension_numbers<[1], [0], [0], [1], [0, 0, 1, 1], [], []>} : vector<16x128xbf16>, vector<128x128xbf16>, vector<16x128xf32> -> vector<16x128xf32>
    %c0_33 = arith.constant 0 : index
    %c0_34 = arith.constant 0 : index
    %59 = vector.load %arg12[%c0_33, %c0_34] : memref<1x128xf32, #tpu.memory_space<vmem>>, vector<1x128xf32>
    %60 = vector.broadcast %59 : vector<1x128xf32> to vector<16x128xf32>
    %61 = arith.addf %58, %60 : vector<16x128xf32>
    %62 = arith.truncf %42 : vector<8x128xf32> to vector<8x128xbf16>
    %63 = arith.truncf %61 : vector<16x128xf32> to vector<16x128xbf16>
    %64 = tpu.concatenate %62, %63 in 0 : vector<8x128xbf16>, vector<16x128xbf16> -> vector<24x128xbf16>
    %cst_35 = arith.constant dense<0.000000e+00> : vector<8x128xf32>
    %65 = tpu.matmul %17, %64, %cst_35 {dimension_numbers = #tpu.dot_dimension_numbers<[1], [0], [0], [1], [0, 0, 1, 1], [], []>} : vector<8x24xbf16>, vector<24x128xbf16>, vector<8x128xf32> -> vector<8x128xf32>
    %66 = tpu.concatenate %42, %65 in 1 : vector<8x128xf32>, vector<8x128xf32> -> vector<8x256xf32>
    %67 = arith.truncf %66 : vector<8x256xf32> to vector<8x256xbf16>
    %c0_36 = arith.constant 0 : index
    %c0_37 = arith.constant 0 : index
    %68 = vector.load %arg13[%c0_36, %c0_37] : memref<256x128xbf16, #tpu.memory_space<vmem>>, vector<256x128xbf16>
    %cst_38 = arith.constant dense<0.000000e+00> : vector<8x128xf32>
    %69 = tpu.matmul %67, %68, %cst_38 {dimension_numbers = #tpu.dot_dimension_numbers<[1], [0], [0], [1], [0, 0, 1, 1], [], []>} : vector<8x256xbf16>, vector<256x128xbf16>, vector<8x128xf32> -> vector<8x128xf32>
    %c0_39 = arith.constant 0 : index
    %c0_40 = arith.constant 0 : index
    %70 = vector.load %arg14[%c0_39, %c0_40] : memref<1x128xf32, #tpu.memory_space<vmem>>, vector<1x128xf32>
    %71 = vector.broadcast %70 : vector<1x128xf32> to vector<8x128xf32>
    %72 = arith.addf %69, %71 : vector<8x128xf32>
    %cst_41 = arith.constant 0.000000e+00 : f32
    %73 = vector.broadcast %cst_41 : f32 to vector<8x128xf32>
    %74 = arith.maximumf %72, %73 : vector<8x128xf32>
    %75 = arith.truncf %74 : vector<8x128xf32> to vector<8x128xbf16>
    %c0_42 = arith.constant 0 : index
    %c0_43 = arith.constant 0 : index
    %76 = vector.load %arg15[%c0_42, %c0_43] : memref<128x128xbf16, #tpu.memory_space<vmem>>, vector<128x128xbf16>
    %cst_44 = arith.constant dense<0.000000e+00> : vector<8x128xf32>
    %77 = tpu.matmul %75, %76, %cst_44 {dimension_numbers = #tpu.dot_dimension_numbers<[1], [0], [0], [1], [0, 0, 1, 1], [], []>} : vector<8x128xbf16>, vector<128x128xbf16>, vector<8x128xf32> -> vector<8x128xf32>
    %c0_45 = arith.constant 0 : index
    %c0_46 = arith.constant 0 : index
    %78 = vector.load %arg16[%c0_45, %c0_46] : memref<1x128xf32, #tpu.memory_space<vmem>>, vector<1x128xf32>
    %79 = vector.broadcast %78 : vector<1x128xf32> to vector<8x128xf32>
    %80 = arith.addf %77, %79 : vector<8x128xf32>
    %cst_47 = arith.constant 0.000000e+00 : f32
    %81 = vector.broadcast %cst_47 : f32 to vector<8x128xf32>
    %82 = arith.maximumf %80, %81 : vector<8x128xf32>
    %83 = arith.truncf %82 : vector<8x128xf32> to vector<8x128xbf16>
    %c0_48 = arith.constant 0 : index
    %c0_49 = arith.constant 0 : index
    %84 = vector.load %arg17[%c0_48, %c0_49] : memref<128x128xbf16, #tpu.memory_space<vmem>>, vector<128x128xbf16>
    %cst_50 = arith.constant dense<0.000000e+00> : vector<8x128xf32>
    %85 = tpu.matmul %83, %84, %cst_50 {dimension_numbers = #tpu.dot_dimension_numbers<[1], [0], [0], [1], [0, 0, 1, 1], [], []>} : vector<8x128xbf16>, vector<128x128xbf16>, vector<8x128xf32> -> vector<8x128xf32>
    %c0_51 = arith.constant 0 : index
    %c0_52 = arith.constant 0 : index
    %86 = vector.load %arg18[%c0_51, %c0_52] : memref<1x128xf32, #tpu.memory_space<vmem>>, vector<1x128xf32>
    %87 = vector.broadcast %86 : vector<1x128xf32> to vector<8x128xf32>
    %88 = arith.addf %85, %87 : vector<8x128xf32>
    %c0_53 = arith.constant 0 : index
    %c0_54 = arith.constant 0 : index
    %89 = vector.load %arg19[%c0_53, %c0_54] : memref<4x128xbf16, #tpu.memory_space<vmem>>, vector<4x128xbf16>
    %cst_55 = arith.constant dense<0.000000e+00> : vector<16x128xf32>
    %90 = tpu.matmul %36, %89, %cst_55 {dimension_numbers = #tpu.dot_dimension_numbers<[1], [0], [0], [1], [0, 0, 1, 1], [], []>} : vector<16x4xbf16>, vector<4x128xbf16>, vector<16x128xf32> -> vector<16x128xf32>
    %c0_56 = arith.constant 0 : index
    %c0_57 = arith.constant 0 : index
    %91 = vector.load %arg20[%c0_56, %c0_57] : memref<1x128xf32, #tpu.memory_space<vmem>>, vector<1x128xf32>
    %92 = vector.broadcast %91 : vector<1x128xf32> to vector<16x128xf32>
    %93 = arith.addf %90, %92 : vector<16x128xf32>
    %94 = arith.truncf %93 : vector<16x128xf32> to vector<16x128xbf16>
    %c0_58 = arith.constant 0 : index
    %c0_59 = arith.constant 0 : index
    %95 = vector.load %arg21[%c0_58, %c0_59] : memref<128x128xbf16, #tpu.memory_space<vmem>>, vector<128x128xbf16>
    %cst_60 = arith.constant dense<0.000000e+00> : vector<16x128xf32>
    %96 = tpu.matmul %94, %95, %cst_60 {dimension_numbers = #tpu.dot_dimension_numbers<[1], [0], [0], [1], [0, 0, 1, 1], [], []>} : vector<16x128xbf16>, vector<128x128xbf16>, vector<16x128xf32> -> vector<16x128xf32>
    %c0_61 = arith.constant 0 : index
    %c0_62 = arith.constant 0 : index
    %97 = vector.load %arg22[%c0_61, %c0_62] : memref<1x128xf32, #tpu.memory_space<vmem>>, vector<1x128xf32>
    %98 = vector.broadcast %97 : vector<1x128xf32> to vector<16x128xf32>
    %99 = arith.addf %96, %98 : vector<16x128xf32>
    %cst_63 = arith.constant 0.000000e+00 : f32
    %100 = vector.broadcast %cst_63 : f32 to vector<16x128xf32>
    %101 = arith.maximumf %99, %100 : vector<16x128xf32>
    %102 = arith.truncf %101 : vector<16x128xf32> to vector<16x128xbf16>
    %c0_64 = arith.constant 0 : index
    %c0_65 = arith.constant 0 : index
    %103 = vector.load %arg23[%c0_64, %c0_65] : memref<128x128xbf16, #tpu.memory_space<vmem>>, vector<128x128xbf16>
    %cst_66 = arith.constant dense<0.000000e+00> : vector<16x128xf32>
    %104 = tpu.matmul %102, %103, %cst_66 {dimension_numbers = #tpu.dot_dimension_numbers<[1], [0], [0], [1], [0, 0, 1, 1], [], []>} : vector<16x128xbf16>, vector<128x128xbf16>, vector<16x128xf32> -> vector<16x128xf32>
    %c0_67 = arith.constant 0 : index
    %c0_68 = arith.constant 0 : index
    %105 = vector.load %arg24[%c0_67, %c0_68] : memref<1x128xf32, #tpu.memory_space<vmem>>, vector<1x128xf32>
    %106 = vector.broadcast %105 : vector<1x128xf32> to vector<16x128xf32>
    %107 = arith.addf %104, %106 : vector<16x128xf32>
    %108 = arith.truncf %88 : vector<8x128xf32> to vector<8x128xbf16>
    %109 = arith.truncf %107 : vector<16x128xf32> to vector<16x128xbf16>
    %110 = tpu.concatenate %108, %109 in 0 : vector<8x128xbf16>, vector<16x128xbf16> -> vector<24x128xbf16>
    %cst_69 = arith.constant dense<0.000000e+00> : vector<8x128xf32>
    %111 = tpu.matmul %17, %110, %cst_69 {dimension_numbers = #tpu.dot_dimension_numbers<[1], [0], [0], [1], [0, 0, 1, 1], [], []>} : vector<8x24xbf16>, vector<24x128xbf16>, vector<8x128xf32> -> vector<8x128xf32>
    %112 = tpu.concatenate %88, %111 in 1 : vector<8x128xf32>, vector<8x128xf32> -> vector<8x256xf32>
    %113 = arith.truncf %112 : vector<8x256xf32> to vector<8x256xbf16>
    %c0_70 = arith.constant 0 : index
    %c0_71 = arith.constant 0 : index
    %114 = vector.load %arg25[%c0_70, %c0_71] : memref<256x128xbf16, #tpu.memory_space<vmem>>, vector<256x128xbf16>
    %cst_72 = arith.constant dense<0.000000e+00> : vector<8x128xf32>
    %115 = tpu.matmul %113, %114, %cst_72 {dimension_numbers = #tpu.dot_dimension_numbers<[1], [0], [0], [1], [0, 0, 1, 1], [], []>} : vector<8x256xbf16>, vector<256x128xbf16>, vector<8x128xf32> -> vector<8x128xf32>
    %c0_73 = arith.constant 0 : index
    %c0_74 = arith.constant 0 : index
    %116 = vector.load %arg26[%c0_73, %c0_74] : memref<1x128xf32, #tpu.memory_space<vmem>>, vector<1x128xf32>
    %117 = vector.broadcast %116 : vector<1x128xf32> to vector<8x128xf32>
    %118 = arith.addf %115, %117 : vector<8x128xf32>
    %cst_75 = arith.constant 0.000000e+00 : f32
    %119 = vector.broadcast %cst_75 : f32 to vector<8x128xf32>
    %120 = arith.maximumf %118, %119 : vector<8x128xf32>
    %121 = arith.truncf %120 : vector<8x128xf32> to vector<8x128xbf16>
    %c0_76 = arith.constant 0 : index
    %c0_77 = arith.constant 0 : index
    %122 = vector.load %arg27[%c0_76, %c0_77] : memref<128x128xbf16, #tpu.memory_space<vmem>>, vector<128x128xbf16>
    %cst_78 = arith.constant dense<0.000000e+00> : vector<8x128xf32>
    %123 = tpu.matmul %121, %122, %cst_78 {dimension_numbers = #tpu.dot_dimension_numbers<[1], [0], [0], [1], [0, 0, 1, 1], [], []>} : vector<8x128xbf16>, vector<128x128xbf16>, vector<8x128xf32> -> vector<8x128xf32>
    %c0_79 = arith.constant 0 : index
    %c0_80 = arith.constant 0 : index
    %124 = vector.load %arg28[%c0_79, %c0_80] : memref<1x128xf32, #tpu.memory_space<vmem>>, vector<1x128xf32>
    %125 = vector.broadcast %124 : vector<1x128xf32> to vector<8x128xf32>
    %126 = arith.addf %123, %125 : vector<8x128xf32>
    %cst_81 = arith.constant 0.000000e+00 : f32
    %127 = vector.broadcast %cst_81 : f32 to vector<8x128xf32>
    %128 = arith.maximumf %126, %127 : vector<8x128xf32>
    %129 = arith.truncf %128 : vector<8x128xf32> to vector<8x128xbf16>
    %cst_82 = arith.constant dense<0.000000e+00> : vector<2x128xf32>
    %130 = tpu.matmul %35, %129, %cst_82 {dimension_numbers = #tpu.dot_dimension_numbers<[1], [0], [0], [1], [0, 0, 1, 1], [], []>} : vector<2x8xbf16>, vector<8x128xbf16>, vector<2x128xf32> -> vector<2x128xf32>
    %131 = arith.truncf %130 : vector<2x128xf32> to vector<2x128xbf16>
    %c0_83 = arith.constant 0 : index
    %c0_84 = arith.constant 0 : index
    %132 = vector.load %arg29[%c0_83, %c0_84] : memref<128x1xbf16, #tpu.memory_space<vmem>>, vector<128x1xbf16>
    %cst_85 = arith.constant dense<0.000000e+00> : vector<2x1xf32>
    %133 = tpu.matmul %131, %132, %cst_85 {dimension_numbers = #tpu.dot_dimension_numbers<[1], [0], [0], [1], [0, 0, 1, 1], [], []>} : vector<2x128xbf16>, vector<128x1xbf16>, vector<2x1xf32> -> vector<2x1xf32>
    %c0_86 = arith.constant 0 : index
    %c0_87 = arith.constant 0 : index
    %134 = vector.load %arg30[%c0_86, %c0_87] : memref<1x1xf32, #tpu.memory_space<vmem>>, vector<1x1xf32>
    %135 = vector.broadcast %134 : vector<1x1xf32> to vector<2x1xf32>
    %136 = arith.addf %133, %135 : vector<2x1xf32>
    %c0_88 = arith.constant 0 : index
    %c0_89 = arith.constant 0 : index
    %137 = vector.load %arg31[%c0_88, %c0_89] : memref<2x1xf32, #tpu.memory_space<vmem>>, vector<2x1xf32>
    tpu.vector_store %arg31[%c0_88, %c0_89], %136 {strides = array<i32>} : memref<2x1xf32, #tpu.memory_space<vmem>>, vector<2x1xf32>,
    return
  }
}

</mosaic_0001>

<bundles_post_ra>
// kernel: tpu_custom_call.1
= control target key start
LH: loop header
LB: loop body
LE: loop exit
PB: predicated region body
PF: predicated region fallthrough
CT: control target
= control target key end

     0   :  { %s3262_s6 = smov 1   ;;  %s3263_s10 = smov 2   ;;  %s3773_s0 = inlined_call_operand.smem [shape: u32[32], index: -1, kind: input, shape index: {}] }
   0x1   :  { %s3330_s5 = sld [smem:[%s3773_s0]]   ;;  %s3264_s14 = smov 3  }
   0x2   :  { %s3335_s9 = sld [smem:[%s3773_s0 + %s3262_s6]]   ;;  %s3265_s18 = smov 4  }
   0x3   :  { %s3340_s13 = sld [smem:[%s3773_s0 + %s3263_s10]]   ;;  %s3266_s22 = smov 5  }
   0x4   :  { %s3345_s17 = sld [smem:[%s3773_s0 + %s3264_s14]]   ;;  %s3267_s26 = smov 6  }
   0x5   :  { %s3350_s21 = sld [smem:[%s3773_s0 + %s3265_s18]]   ;;  %s3268_s30 = smov 7  }
   0x6   :  { %s3355_s25 = sld [smem:[%s3773_s0 + %s3266_s22]]   ;;  %s3269_s4 = smov 8  }
   0x7   :  { %3785 = sst [smem:[#allocation49_spill]] %s3330_s5  ;;  %s3270_s10 = smov 9  }
   0x8   :  { %s3360_s29 = sld [smem:[%s3773_s0 + %s3267_s26]]   ;;  %s3271_s15 = smov 10  }
   0x9   :  { %s3365_s3 = sld [smem:[%s3773_s0 + %s3268_s30]]   ;;  %s3272_s20 = smov 11  }
   0xa   :  { %3786 = sst [smem:[#allocation50_spill]] %s3345_s17  ;;  %s3273_s26 = smov 12  }
   0xb   :  { %3787 = sst [smem:[#allocation51_spill]] %s3350_s21  ;;  %s3274_s1 = smov 13  }
   0xc   :  { %s3370_s8 = sld [smem:[%s3773_s0 + %s3269_s4]]   ;;  %s3275_s7 = smov 14  }
   0xd   :  { %s3375_s14 = sld [smem:[%s3773_s0 + %s3270_s10]]   ;;  %s3277_s22 = smov 16  }
   0xe   :  { %s3380_s19 = sld [smem:[%s3773_s0 + %s3271_s15]]   ;;  %s3276_s15 = smov 15  }
   0xf   :  { %s3385_s24 = sld [smem:[%s3773_s0 + %s3272_s20]]   ;;  %s3278_s28 = smov 17  }
  0x10   :  { %s3390_s30 = sld [smem:[%s3773_s0 + %s3273_s26]]   ;;  %s3292_s16 = smov 31  }
  0x11   :  { %s3395_s6 = sld [smem:[%s3773_s0 + %s3274_s1]]  }
  0x12   :  { %s3400_s12 = sld [smem:[%s3773_s0 + %s3275_s7]]   ;;  %s3279_s7 = smov 18  }
  0x13   :  { %s3405_s20 = sld [smem:[%s3773_s0 + %s3276_s15]]   ;;  %s3280_s15 = smov 19  }
  0x14   :  { %s3410_s27 = sld [smem:[%s3773_s0 + %s3277_s22]]   ;;  %s3281_s22 = smov 20  }
  0x15   :  { %3788 = sst [smem:[#allocation52_spill]] %s3385_s24 }
  0x16   :  { %s3415_s4 = sld [smem:[%s3773_s0 + %s3278_s28]]   ;;  %s3282_s28 = smov 21  }
  0x17   :  { %3789 = sst [smem:[#allocation53_spill]] %s3395_s6 }
  0x18   :  { %3790 = sst [smem:[#allocation54_spill]] %s3400_s12 }
  0x19   :  { %s3420_s6 = sld [smem:[%s3773_s0 + %s3279_s7]]   ;;  %s3283_s7 = smov 22  }
  0x1a   :  { %3791 = sst [smem:[#allocation55_spill]] %s3410_s27 }
  0x1b   :  { %s3425_s21 = sld [smem:[%s3773_s0 + %s3280_s15]]   ;;  %s3284_s15 = smov 23  }
  0x1c   :  { %s3430_s17 = sld [smem:[%s3773_s0 + %s3281_s22]]   ;;  %s3285_s22 = smov 24  }
  0x1d   :  { %s3435_s5 = sld [smem:[%s3773_s0 + %s3282_s28]]   ;;  %s3286_s28 = smov 25  }
  0x1e   :  { %s3445_s27 = sld [smem:[%s3773_s0 + %s3284_s15]]   ;;  %s3288_s15 = smov 27  }
  0x1f   :  { %3792 = sst [smem:[#allocation56_spill]] %s3420_s6 }
  0x20   :  { %s3440_s6 = sld [smem:[%s3773_s0 + %s3283_s7]]   ;;  %s3287_s7 = smov 26  }
  0x21   :  { %s3455_s12 = sld [smem:[%s3773_s0 + %s3286_s28]]   ;;  %s3290_s28 = smov 29  }
  0x22   :  { %3793 = sst [smem:[#allocation57_spill]] %s3430_s17 }
  0x23   :  { %s3450_s17 = sld [smem:[%s3773_s0 + %s3285_s22]]   ;;  %s3289_s22 = smov 28  }
  0x24   :  { %s3465_s24 = sld [smem:[%s3773_s0 + %s3288_s15]]  }
  0x26   :  { %3794 = sst [smem:[#allocation58_spill]] %s3440_s6 }
  0x27   :  { %3796 = sst [smem:[#allocation60_spill]] %s3455_s12 }
  0x28   :  { %s3460_s6 = sld [smem:[%s3773_s0 + %s3287_s7]]   ;;  %s3291_s7 = smov 30  }
  0x29   :  { %3795 = sst [smem:[#allocation59_spill]] %s3450_s17 }
  0x2a   :  { %3798 = sst [smem:[#allocation62_spill]] %s3465_s24 }
  0x2b   :  { %s3470_s17 = sld [smem:[%s3773_s0 + %s3289_s22]]  }
  0x2c   :  { %s3475_s12 = sld [smem:[%s3773_s0 + %s3290_s28]]  }
  0x2d   :  { %s3483_s24 = sld [smem:[%s3773_s0 + %s3292_s16]]  }
  0x2e   :  { %3797 = sst [smem:[#allocation61_spill]] %s3460_s6 }
  0x2f   :  { %s2129_s6 = sld [smem:[%s3773_s0 + %s3291_s7]]  }
  0x35   :  { %v68_v0 = vstv %s2129_s6 }
  0x36   :  { %69 = vst [vmem:[#allocation2] sm:$0x1] %v68_v0 }
  0x37   :  { %70 = vsyncpa [#allocation4], 0 }
  0x38   :  { %71 = vsyncpa [#allocation6], 0 }
  0x39   :  { %72 = vsyncpa [#allocation9], 0 }
  0x3a   :  { %73 = vsyncpa [#allocation12], 0 }
  0x3b   :  { %74 = vsyncpa [#allocation15], 0 }
  0x3c   :  { %75 = vsyncpa [#allocation18], 0 }
  0x3d   :  { %76 = vsyncpa [#allocation21], 0 }
  0x3e   :  { %77 = vsyncpa [#allocation24], 0 }
  0x3f   :  { %78 = vsyncpa [#allocation27], 0 }
  0x40   :  { %79 = vsyncpa [#allocation30], 0 }
  0x41   :  { %80 = vsyncpa [#allocation33], 0 }
  0x42   :  { %81 = vsyncpa [#allocation36], 0  ;;  %s3293_s22 = smov [#allocation5]   ;;  %s3294_s23 = smov [#allocation8]  }
  0x43   :  { %s100_s0 = sshll.u32 %s3293_s22, 4  ;;  %s124_s6 = sshll.u32 %s3294_s23, 4  ;;  %s101_s0 = int_to_ptr.vmem [resolvable:$true] %s100_s0  ;;  %s125_s6 = int_to_ptr.vmem [resolvable:$true] %s124_s6 }
  0x44   :  { %s2754_s26 = scalar_lea.hbm %s3340_s13, 16 }
  0x45   :  { %p2755_p0 = scmp.ne.s32.totalorder %s3340_s13, %s2754_s26  ;;  %p2758_p1 = scmp.lt.u32.totalorder %s2754_s26, %s3340_s13 }
  0x47   :  { %p2760_p2 = pnand %p2758_p1, %p2755_p0 }
  0x49   :  { %2763 = shalt.err (!%p2760_p2)
}
  0x4a   :  { %s2764_s28 = scalar_lea.vmem %s101_s0, 16  ;;  %s2768_s1 = scalar_lea.vmem %s101_s0, 32 }
  0x4b   :  { %p2765_p3 = scmp.ne.s32.totalorder %s101_s0, %s2764_s28  ;;  %p2769_p4 = scmp.lt.s32.totalorder %s101_s0, %s101_s0 }
  0x4c   :  { %p2770_p5 = scmp.lt.s32.totalorder %s2768_s1, %s2764_s28 }
  0x4e   :  { %p2771_p6 = por %p2770_p5, %p2769_p4 }
  0x50   :  { %p2772_p7 = pnand %p2771_p6, %p2765_p3 }
  0x52   :  { %2775 = shalt.err (!%p2772_p7)
}
  0x53   :  { %103 = dma.hbm_to_vmem [thread:$0]  %s3340_s13, 16, %s101_s0, [#allocation6]  }
  0x54   :  { %s2776_s2 = scalar_lea.hbm %s3360_s29, 16 }
  0x55   :  { %p2777_p8 = scmp.ne.s32.totalorder %s3360_s29, %s2776_s2  ;;  %p2780_p9 = scmp.lt.u32.totalorder %s2776_s2, %s3360_s29 }
  0x57   :  { %p2782_p10 = pnand %p2780_p9, %p2777_p8 }
  0x59   :  { %2785 = shalt.err (!%p2782_p10)
}
  0x5a   :  { %s2786_s7 = scalar_lea.vmem %s125_s6, 16  ;;  %s2790_s10 = scalar_lea.vmem %s125_s6, 32 }
  0x5b   :  { %p2787_p11 = scmp.ne.s32.totalorder %s125_s6, %s2786_s7  ;;  %p2791_p12 = scmp.lt.s32.totalorder %s125_s6, %s125_s6 }
  0x5c   :  { %p2792_p13 = scmp.lt.s32.totalorder %s2790_s10, %s2786_s7 }
  0x5e   :  { %p2793_p0 = por %p2792_p13, %p2791_p12 }
  0x60   :  { %p2794_p1 = pnand %p2793_p0, %p2787_p11 }
  0x62   :  { %2797 = shalt.err (!%p2794_p1)
}
  0x63   :  { %127 = dma.hbm_to_vmem [thread:$0]  %s3360_s29, 16, %s125_s6, [#allocation9]  }
  0x64   :  { %s3295_s11 = smov [#allocation11]   ;;  %s3296_s16 = smov [#allocation14]  }
  0x65   :  { %s144_s13 = sshll.u32 %s3295_s11, 4  ;;  %s166_s15 = sshll.u32 %s3296_s16, 4  ;;  %s145_s13 = int_to_ptr.vmem [resolvable:$true] %s144_s13  ;;  %s167_s15 = int_to_ptr.vmem [resolvable:$true] %s166_s15 }
  0x66   :  { %s2798_s18 = scalar_lea.hbm %s3370_s8, 16 }
  0x67   :  { %p2799_p2 = scmp.ne.s32.totalorder %s3370_s8, %s2798_s18  ;;  %p2802_p3 = scmp.lt.u32.totalorder %s2798_s18, %s3370_s8 }
  0x69   :  { %p2804_p4 = pnand %p2802_p3, %p2799_p2 }
  0x6b   :  { %2807 = shalt.err (!%p2804_p4)
}
  0x6c   :  { %s2808_s22 = scalar_lea.vmem %s145_s13, 16  ;;  %s2812_s0 = scalar_lea.vmem %s145_s13, 32 }
  0x6d   :  { %p2809_p5 = scmp.ne.s32.totalorder %s145_s13, %s2808_s22  ;;  %p2813_p6 = scmp.lt.s32.totalorder %s145_s13, %s145_s13 }
  0x6e   :  { %p2814_p7 = scmp.lt.s32.totalorder %s2812_s0, %s2808_s22 }
  0x70   :  { %p2815_p8 = por %p2814_p7, %p2813_p6 }
  0x72   :  { %p2816_p9 = pnand %p2815_p8, %p2809_p5 }
  0x74   :  { %2819 = shalt.err (!%p2816_p9)
}
  0x75   :  { %147 = dma.hbm_to_vmem [thread:$0]  %s3370_s8, 16, %s145_s13, [#allocation12]  }
  0x76   :  { %s2820_s29 = scalar_lea.hbm %s3380_s19, 16 }
  0x77   :  { %p2821_p10 = scmp.ne.s32.totalorder %s3380_s19, %s2820_s29  ;;  %p2824_p11 = scmp.lt.u32.totalorder %s2820_s29, %s3380_s19 }
  0x79   :  { %p2826_p12 = pnand %p2824_p11, %p2821_p10 }
  0x7b   :  { %2829 = shalt.err (!%p2826_p12)
}
  0x7c   :  { %s2830_s23 = scalar_lea.vmem %s167_s15, 16  ;;  %s2834_s6 = scalar_lea.vmem %s167_s15, 32 }
  0x7d   :  { %p2831_p13 = scmp.ne.s32.totalorder %s167_s15, %s2830_s23  ;;  %p2835_p0 = scmp.lt.s32.totalorder %s167_s15, %s167_s15 }
  0x7e   :  { %p2836_p1 = scmp.lt.s32.totalorder %s2834_s6, %s2830_s23 }
  0x80   :  { %p2837_p2 = por %p2836_p1, %p2835_p0 }
  0x82   :  { %p2838_p3 = pnand %p2837_p2, %p2831_p13 }
  0x84   :  { %2841 = shalt.err (!%p2838_p3)
}
  0x85   :  { %169 = dma.hbm_to_vmem [thread:$0]  %s3380_s19, 16, %s167_s15, [#allocation15]  }
  0x86   :  { %s3297_s26 = smov [#allocation17]   ;;  %s2842_s28 = scalar_lea.hbm %s3390_s30, 16 }
  0x87   :  { %s188_s8 = sshll.u32 %s3297_s26, 4  ;;  %p2843_p4 = scmp.ne.s32.totalorder %s3390_s30, %s2842_s28  ;;  %s189_s8 = int_to_ptr.vmem [resolvable:$true] %s188_s8 }
  0x88   :  { %p2846_p5 = scmp.lt.u32.totalorder %s2842_s28, %s3390_s30 }
  0x8a   :  { %p2848_p6 = pnand %p2846_p5, %p2843_p4 }
  0x8c   :  { %2851 = shalt.err (!%p2848_p6)
}
  0x8d   :  { %s2852_s1 = scalar_lea.vmem %s189_s8, 16  ;;  %s2856_s2 = scalar_lea.vmem %s189_s8, 32 }
  0x8e   :  { %p2853_p7 = scmp.ne.s32.totalorder %s189_s8, %s2852_s1  ;;  %p2857_p8 = scmp.lt.s32.totalorder %s189_s8, %s189_s8 }
  0x8f   :  { %p2858_p9 = scmp.lt.s32.totalorder %s2856_s2, %s2852_s1 }
  0x91   :  { %p2859_p10 = por %p2858_p9, %p2857_p8 }
  0x93   :  { %p2860_p11 = pnand %p2859_p10, %p2853_p7 }
  0x95   :  { %2863 = shalt.err (!%p2860_p11)
}
  0x96   :  { %191 = dma.hbm_to_vmem [thread:$0]  %s3390_s30, 16, %s189_s8, [#allocation18]  }
  0x97   :  { %s3298_s19 = smov [#allocation20]   ;;  %s3299_s10 = smov [#allocation23]  }
  0x98   :  { %s209_s7 = sshll.u32 %s3298_s19, 4  ;;  %s231_s11 = sshll.u32 %s3299_s10, 4  ;;  %s210_s7 = int_to_ptr.vmem [resolvable:$true] %s209_s7  ;;  %s232_s11 = int_to_ptr.vmem [resolvable:$true] %s231_s11 }
  0x99   :  { %s2864_s13 = scalar_lea.hbm %s3405_s20, 1024 }
  0x9a   :  { %p2865_p12 = scmp.ne.s32.totalorder %s3405_s20, %s2864_s13  ;;  %p2868_p13 = scmp.lt.u32.totalorder %s2864_s13, %s3405_s20 }
  0x9c   :  { %p2870_p0 = pnand %p2868_p13, %p2865_p12 }
  0x9e   :  { %2873 = shalt.err (!%p2870_p0)
}
  0x9f   :  { %s2874_s16 = scalar_lea.vmem %s210_s7, 1024  ;;  %p2879_p2 = scmp.lt.s32.totalorder %s210_s7, %s210_s7 }
  0xa0   :  { %p2875_p1 = scmp.ne.s32.totalorder %s210_s7, %s2874_s16  ;;  %p2880_p3 = scmp.lt.s32.totalorder %s2874_s16, %s2874_s16 }
  0xa2   :  { %p2881_p4 = por %p2880_p3, %p2879_p2 }
  0xa4   :  { %p2882_p5 = pnand %p2881_p4, %p2875_p1 }
  0xa6   :  { %2885 = shalt.err (!%p2882_p5)
}
  0xa7   :  { %s3300_s15 = smov 64   ;;  %s3301_s30 = smov 4  }
  0xa8   :  { %215 = dma.hbm_to_vmem [thread:$0]  %s3405_s20, 1024, %s210_s7, [#allocation21], %s3300_s15, %s3300_s15, %s3301_s30  }
  0xa9   :  { %s2886_s18 = scalar_lea.hbm %s3415_s4, 1024 }
  0xaa   :  { %p2887_p6 = scmp.ne.s32.totalorder %s3415_s4, %s2886_s18  ;;  %p2890_p7 = scmp.lt.u32.totalorder %s2886_s18, %s3415_s4 }
  0xac   :  { %p2892_p8 = pnand %p2890_p7, %p2887_p6 }
  0xae   :  { %2895 = shalt.err (!%p2892_p8)
}
  0xaf   :  { %s2896_s22 = scalar_lea.vmem %s232_s11, 1024  ;;  %p2901_p10 = scmp.lt.s32.totalorder %s232_s11, %s232_s11 }
  0xb0   :  { %p2897_p9 = scmp.ne.s32.totalorder %s232_s11, %s2896_s22  ;;  %p2902_p11 = scmp.lt.s32.totalorder %s2896_s22, %s2896_s22 }
  0xb2   :  { %p2903_p12 = por %p2902_p11, %p2901_p10 }
  0xb4   :  { %p2904_p13 = pnand %p2903_p12, %p2897_p9 }
  0xb6   :  { %2907 = shalt.err (!%p2904_p13)
}
  0xb7   :  { %237 = dma.hbm_to_vmem [thread:$0]  %s3415_s4, 1024, %s232_s11, [#allocation24], %s3300_s15, %s3300_s15, %s3301_s30  }
  0xb8   :  { %s3302_s20 = smov [#allocation26]   ;;  %s3303_s29 = smov [#allocation29]  }
  0xb9   :  { %s254_s0 = sshll.u32 %s3302_s20, 4  ;;  %s273_s23 = sshll.u32 %s3303_s29, 4  ;;  %s255_s0 = int_to_ptr.vmem [resolvable:$true] %s254_s0  ;;  %s274_s23 = int_to_ptr.vmem [resolvable:$true] %s273_s23 }
  0xba   :  { %s2908_s6 = scalar_lea.hbm %s3425_s21, 32 }
  0xbb   :  { %p2909_p0 = scmp.ne.s32.totalorder %s3425_s21, %s2908_s6  ;;  %p2912_p1 = scmp.lt.u32.totalorder %s2908_s6, %s3425_s21 }
  0xbd   :  { %p2914_p2 = pnand %p2912_p1, %p2909_p0 }
  0xbf   :  { %2917 = shalt.err (!%p2914_p2)
}
  0xc0   :  { %s2918_s26 = scalar_lea.vmem %s255_s0, 32  ;;  %p2923_p4 = scmp.lt.s32.totalorder %s255_s0, %s255_s0 }
  0xc1   :  { %p2919_p3 = scmp.ne.s32.totalorder %s255_s0, %s2918_s26  ;;  %p2924_p5 = scmp.lt.s32.totalorder %s2918_s26, %s2918_s26 }
  0xc3   :  { %p2925_p6 = por %p2924_p5, %p2923_p4 }
  0xc5   :  { %p2926_p7 = pnand %p2925_p6, %p2919_p3 }
  0xc7   :  { %2929 = shalt.err (!%p2926_p7)
}
  0xc8   :  { %257 = dma.hbm_to_vmem [thread:$0]  %s3425_s21, 32, %s255_s0, [#allocation27]  }
  0xc9   :  { %s2930_s4 = scalar_lea.hbm %s3435_s5, 1024 }
  0xca   :  { %p2931_p8 = scmp.ne.s32.totalorder %s3435_s5, %s2930_s4  ;;  %p2934_p9 = scmp.lt.u32.totalorder %s2930_s4, %s3435_s5 }
  0xcc   :  { %p2936_p10 = pnand %p2934_p9, %p2931_p8 }
  0xce   :  { %2939 = shalt.err (!%p2936_p10)
}
  0xcf   :  { %s2940_s8 = scalar_lea.vmem %s274_s23, 1024  ;;  %p2945_p12 = scmp.lt.s32.totalorder %s274_s23, %s274_s23 }
  0xd0   :  { %p2941_p11 = scmp.ne.s32.totalorder %s274_s23, %s2940_s8  ;;  %p2946_p13 = scmp.lt.s32.totalorder %s2940_s8, %s2940_s8 }
  0xd2   :  { %p2947_p0 = por %p2946_p13, %p2945_p12 }
  0xd4   :  { %p2948_p1 = pnand %p2947_p0, %p2941_p11 }
  0xd6   :  { %2951 = shalt.err (!%p2948_p1)
}
  0xd7   :  { %279 = dma.hbm_to_vmem [thread:$0]  %s3435_s5, 1024, %s274_s23, [#allocation30], %s3300_s15, %s3300_s15, %s3301_s30  }
  0xd8   :  { %s3304_s21 = smov [#allocation32]   ;;  %s3305_s1 = smov [#allocation3]  }
  0xd9   :  { %s295_s28 = sshll.u32 %s3304_s21, 4  ;;  %s90_s2 = sshll.u32 %s3305_s1, 4  ;;  %s296_s28 = int_to_ptr.vmem [resolvable:$true] %s295_s28  ;;  %s91_s2 = int_to_ptr.vmem [resolvable:$true] %s90_s2 }
  0xda   :  { %s2952_s19 = scalar_lea.hbm %s3445_s27, 1024 }
  0xdb   :  { %p2953_p2 = scmp.ne.s32.totalorder %s3445_s27, %s2952_s19  ;;  %p2956_p3 = scmp.lt.u32.totalorder %s2952_s19, %s3445_s27 }
  0xdd   :  { %p2958_p4 = pnand %p2956_p3, %p2953_p2 }
  0xdf   :  { %2961 = shalt.err (!%p2958_p4)
}
  0xe0   :  { %s2962_s7 = scalar_lea.vmem %s296_s28, 1024  ;;  %p2967_p6 = scmp.lt.s32.totalorder %s296_s28, %s296_s28 }
  0xe1   :  { %p2963_p5 = scmp.ne.s32.totalorder %s296_s28, %s2962_s7  ;;  %p2968_p7 = scmp.lt.s32.totalorder %s2962_s7, %s2962_s7 }
  0xe3   :  { %p2969_p8 = por %p2968_p7, %p2967_p6 }
  0xe5   :  { %p2970_p9 = pnand %p2969_p8, %p2963_p5 }
  0xe7   :  { %2973 = shalt.err (!%p2970_p9)
}
  0xe8   :  { %301 = dma.hbm_to_vmem [thread:$0]  %s3445_s27, 1024, %s296_s28, [#allocation33], %s3300_s15, %s3300_s15, %s3301_s30  }
  0xe9   :  { %s2974_s5 = scalar_lea.hbm %s3335_s9, 16 }
  0xea   :  { %p2975_p10 = scmp.ne.s32.totalorder %s3335_s9, %s2974_s5  ;;  %p2978_p11 = scmp.lt.u32.totalorder %s2974_s5, %s3335_s9 }
  0xec   :  { %p2980_p12 = pnand %p2978_p11, %p2975_p10 }
  0xee   :  { %2983 = shalt.err (!%p2980_p12)
}
  0xef   :  { %s2984_s10 = scalar_lea.vmem %s91_s2, 16  ;;  %s2988_s11 = scalar_lea.vmem %s91_s2, 32 }
  0xf0   :  { %p2985_p13 = scmp.ne.s32.totalorder %s91_s2, %s2984_s10  ;;  %p2989_p0 = scmp.lt.s32.totalorder %s91_s2, %s91_s2 }
  0xf1   :  { %p2990_p1 = scmp.lt.s32.totalorder %s2988_s11, %s2984_s10 }
  0xf3   :  { %p2991_p2 = por %p2990_p1, %p2989_p0 }
  0xf5   :  { %p2992_p3 = pnand %p2991_p2, %p2985_p13 }
  0xf7   :  { %2995 = shalt.err (!%p2992_p3)
}
  0xf8   :  { %93 = dma.hbm_to_vmem [thread:$0]  %s3335_s9, 16, %s91_s2, [#allocation4]  }
  0xf9   :  { %s3306_s27 = smov [#allocation7]   ;;  %s3307_s16 = smov [#allocation10]  }
  0xfa   :  { %s114_s13 = sshll.u32 %s3306_s27, 4  ;;  %s134_s18 = sshll.u32 %s3307_s16, 4  ;;  %s115_s13 = int_to_ptr.vmem [resolvable:$true] %s114_s13  ;;  %s135_s18 = int_to_ptr.vmem [resolvable:$true] %s134_s18 }
  0xfb   :  { %s2996_s22 = scalar_lea.hbm %s3355_s25, 32 }
  0xfc   :  { %p2997_p4 = scmp.ne.s32.totalorder %s3355_s25, %s2996_s22  ;;  %p3000_p5 = scmp.lt.u32.totalorder %s2996_s22, %s3355_s25 }
  0xfe   :  { %p3002_p6 = pnand %p3000_p5, %p2997_p4 }
 0x100   :  { %3005 = shalt.err (!%p3002_p6)
}
 0x101   :  { %s3006_s20 = scalar_lea.vmem %s115_s13, 32  ;;  %p3011_p8 = scmp.lt.s32.totalorder %s115_s13, %s115_s13 }
 0x102   :  { %p3007_p7 = scmp.ne.s32.totalorder %s115_s13, %s3006_s20  ;;  %p3012_p9 = scmp.lt.s32.totalorder %s3006_s20, %s3006_s20 }
 0x104   :  { %p3013_p10 = por %p3012_p9, %p3011_p8 }
 0x106   :  { %p3014_p11 = pnand %p3013_p10, %p3007_p7 }
 0x108   :  { %3017 = shalt.err (!%p3014_p11)
}
 0x109   :  { %117 = dma.hbm_to_vmem [thread:$0]  %s3355_s25, 32, %s115_s13, [#allocation6]  }
 0x10a   :  { %s3018_s9 = scalar_lea.hbm %s3365_s3, 32 }
 0x10b   :  { %p3019_p12 = scmp.ne.s32.totalorder %s3365_s3, %s3018_s9  ;;  %p3022_p13 = scmp.lt.u32.totalorder %s3018_s9, %s3365_s3 }
 0x10d   :  { %p3024_p0 = pnand %p3022_p13, %p3019_p12 }
 0x10f   :  { %3027 = shalt.err (!%p3024_p0)
}
 0x110   :  { %s3028_s0 = scalar_lea.vmem %s135_s18, 32  ;;  %p3033_p2 = scmp.lt.s32.totalorder %s135_s18, %s135_s18 }
 0x111   :  { %p3029_p1 = scmp.ne.s32.totalorder %s135_s18, %s3028_s0  ;;  %p3034_p3 = scmp.lt.s32.totalorder %s3028_s0, %s3028_s0 }
 0x113   :  { %p3035_p4 = por %p3034_p3, %p3033_p2 }
 0x115   :  { %p3036_p5 = pnand %p3035_p4, %p3029_p1 }
 0x117   :  { %3039 = shalt.err (!%p3036_p5)
}
 0x118   :  { %137 = dma.hbm_to_vmem [thread:$0]  %s3365_s3, 32, %s135_s18, [#allocation9]  }
 0x119   :  { %s3308_s29 = smov [#allocation13]   ;;  %s3309_s23 = smov [#allocation16]  }
 0x11a   :  { %s153_s25 = sshll.u32 %s3308_s29, 4  ;;  %s175_s6 = sshll.u32 %s3309_s23, 4  ;;  %s154_s25 = int_to_ptr.vmem [resolvable:$true] %s153_s25  ;;  %s176_s6 = int_to_ptr.vmem [resolvable:$true] %s175_s6 }
 0x11b   :  { %s3040_s26 = scalar_lea.hbm %s3375_s14, 1024 }
 0x11c   :  { %p3041_p6 = scmp.ne.s32.totalorder %s3375_s14, %s3040_s26  ;;  %p3044_p7 = scmp.lt.u32.totalorder %s3040_s26, %s3375_s14 }
 0x11e   :  { %p3046_p8 = pnand %p3044_p7, %p3041_p6 }
 0x120   :  { %3049 = shalt.err (!%p3046_p8)
}
 0x121   :  { %s3050_s4 = scalar_lea.vmem %s154_s25, 1024  ;;  %p3055_p10 = scmp.lt.s32.totalorder %s154_s25, %s154_s25 }
 0x122   :  { %p3051_p9 = scmp.ne.s32.totalorder %s154_s25, %s3050_s4  ;;  %p3056_p11 = scmp.lt.s32.totalorder %s3050_s4, %s3050_s4 }
 0x124   :  { %p3057_p12 = por %p3056_p11, %p3055_p10 }
 0x126   :  { %p3058_p13 = pnand %p3057_p12, %p3051_p9 }
 0x128   :  { %3061 = shalt.err (!%p3058_p13)
}
 0x129   :  { %s3799_s3 = sld [smem:[#allocation52_spill]] }
 0x12a   :  { %159 = dma.hbm_to_vmem [thread:$0]  %s3375_s14, 1024, %s154_s25, [#allocation12], %s3300_s15, %s3300_s15, %s3301_s30  }
 0x12f   :  { %s3062_s8 = scalar_lea.hbm %s3799_s3, 1024 }
 0x130   :  { %p3063_p0 = scmp.ne.s32.totalorder %s3799_s3, %s3062_s8  ;;  %p3066_p1 = scmp.lt.u32.totalorder %s3062_s8, %s3799_s3 }
 0x132   :  { %p3068_p2 = pnand %p3066_p1, %p3063_p0 }
 0x134   :  { %3071 = shalt.err (!%p3068_p2)
}
 0x135   :  { %s3072_s21 = scalar_lea.vmem %s176_s6, 1024  ;;  %p3077_p4 = scmp.lt.s32.totalorder %s176_s6, %s176_s6 }
 0x136   :  { %p3073_p3 = scmp.ne.s32.totalorder %s176_s6, %s3072_s21  ;;  %p3078_p5 = scmp.lt.s32.totalorder %s3072_s21, %s3072_s21 }
 0x138   :  { %p3079_p6 = por %p3078_p5, %p3077_p4 }
 0x13a   :  { %p3080_p7 = pnand %p3079_p6, %p3073_p3 }
 0x13c   :  { %3083 = shalt.err (!%p3080_p7)
}
 0x13d   :  { %s3800_s28 = sld [smem:[#allocation54_spill]]  ;;  %s3310_s14 = smov [#allocation19]  }
 0x13e   :  { %181 = dma.hbm_to_vmem [thread:$0]  %s3799_s3, 1024, %s176_s6, [#allocation15], %s3300_s15, %s3300_s15, %s3301_s30  }
 0x13f   :  { %s200_s1 = sshll.u32 %s3310_s14, 4  ;;  %s3311_s2 = smov [#allocation22]   ;;  %s201_s1 = int_to_ptr.vmem [resolvable:$true] %s200_s1 }
 0x140   :  { %s222_s19 = sshll.u32 %s3311_s2, 4  ;;  %s223_s19 = int_to_ptr.vmem [resolvable:$true] %s222_s19 }
 0x143   :  { %s3084_s7 = scalar_lea.hbm %s3800_s28, 16 }
 0x144   :  { %p3085_p8 = scmp.ne.s32.totalorder %s3800_s28, %s3084_s7  ;;  %p3088_p9 = scmp.lt.u32.totalorder %s3084_s7, %s3800_s28 }
 0x146   :  { %p3090_p10 = pnand %p3088_p9, %p3085_p8 }
 0x148   :  { %3093 = shalt.err (!%p3090_p10)
}
 0x149   :  { %s3094_s5 = scalar_lea.vmem %s201_s1, 16  ;;  %s3098_s10 = scalar_lea.vmem %s201_s1, 32 }
 0x14a   :  { %p3095_p11 = scmp.ne.s32.totalorder %s201_s1, %s3094_s5  ;;  %p3099_p12 = scmp.lt.s32.totalorder %s201_s1, %s201_s1 }
 0x14b   :  { %p3100_p13 = scmp.lt.s32.totalorder %s3098_s10, %s3094_s5 }
 0x14d   :  { %p3101_p0 = por %p3100_p13, %p3099_p12 }
 0x14f   :  { %p3102_p1 = pnand %p3101_p0, %p3095_p11 }
 0x151   :  { %3105 = shalt.err (!%p3102_p1)
}
 0x152   :  { %s3801_s11 = sld [smem:[#allocation55_spill]] }
 0x153   :  { %203 = dma.hbm_to_vmem [thread:$0]  %s3800_s28, 16, %s201_s1, [#allocation18]  }
 0x158   :  { %s3106_s27 = scalar_lea.hbm %s3801_s11, 16 }
 0x159   :  { %p3107_p2 = scmp.ne.s32.totalorder %s3801_s11, %s3106_s27  ;;  %p3110_p3 = scmp.lt.u32.totalorder %s3106_s27, %s3801_s11 }
 0x15b   :  { %p3112_p4 = pnand %p3110_p3, %p3107_p2 }
 0x15d   :  { %3115 = shalt.err (!%p3112_p4)
}
 0x15e   :  { %s3116_s13 = scalar_lea.vmem %s223_s19, 16  ;;  %s3120_s16 = scalar_lea.vmem %s223_s19, 32 }
 0x15f   :  { %p3117_p5 = scmp.ne.s32.totalorder %s223_s19, %s3116_s13  ;;  %p3121_p6 = scmp.lt.s32.totalorder %s223_s19, %s223_s19 }
 0x160   :  { %p3122_p7 = scmp.lt.s32.totalorder %s3120_s16, %s3116_s13 }
 0x162   :  { %p3123_p8 = por %p3122_p7, %p3121_p6 }
 0x164   :  { %p3124_p9 = pnand %p3123_p8, %p3117_p5 }
 0x166   :  { %3127 = shalt.err (!%p3124_p9)
}
 0x167   :  { %s3802_s18 = sld [smem:[#allocation56_spill]]  ;;  %s3312_s22 = smov [#allocation25]  }
 0x168   :  { %225 = dma.hbm_to_vmem [thread:$0]  %s3801_s11, 16, %s223_s19, [#allocation21]  }
 0x169   :  { %s244_s20 = sshll.u32 %s3312_s22, 4  ;;  %s3313_s9 = smov [#allocation28]   ;;  %s245_s20 = int_to_ptr.vmem [resolvable:$true] %s244_s20 }
 0x16a   :  { %s264_s0 = sshll.u32 %s3313_s9, 4  ;;  %s265_s0 = int_to_ptr.vmem [resolvable:$true] %s264_s0 }
 0x16d   :  { %s3128_s29 = scalar_lea.hbm %s3802_s18, 16 }
 0x16e   :  { %p3129_p10 = scmp.ne.s32.totalorder %s3802_s18, %s3128_s29  ;;  %p3132_p11 = scmp.lt.u32.totalorder %s3128_s29, %s3802_s18 }
 0x170   :  { %p3134_p12 = pnand %p3132_p11, %p3129_p10 }
 0x172   :  { %3137 = shalt.err (!%p3134_p12)
}
 0x173   :  { %s3138_s25 = scalar_lea.vmem %s245_s20, 16  ;;  %s3142_s23 = scalar_lea.vmem %s245_s20, 32 }
 0x174   :  { %p3139_p13 = scmp.ne.s32.totalorder %s245_s20, %s3138_s25  ;;  %p3143_p0 = scmp.lt.s32.totalorder %s245_s20, %s245_s20 }
 0x175   :  { %p3144_p1 = scmp.lt.s32.totalorder %s3142_s23, %s3138_s25 }
 0x177   :  { %p3145_p2 = por %p3144_p1, %p3143_p0 }
 0x179   :  { %p3146_p3 = pnand %p3145_p2, %p3139_p13 }
 0x17b   :  { %3149 = shalt.err (!%p3146_p3)
}
 0x17c   :  { %s3803_s6 = sld [smem:[#allocation57_spill]] }
 0x17d   :  { %247 = dma.hbm_to_vmem [thread:$0]  %s3802_s18, 16, %s245_s20, [#allocation24]  }
 0x182   :  { %s3150_s26 = scalar_lea.hbm %s3803_s6, 16 }
 0x183   :  { %p3151_p4 = scmp.ne.s32.totalorder %s3803_s6, %s3150_s26  ;;  %p3154_p5 = scmp.lt.u32.totalorder %s3150_s26, %s3803_s6 }
 0x185   :  { %p3156_p6 = pnand %p3154_p5, %p3151_p4 }
 0x187   :  { %3159 = shalt.err (!%p3156_p6)
}
 0x188   :  { %s3160_s4 = scalar_lea.vmem %s265_s0, 16  ;;  %s3164_s3 = scalar_lea.vmem %s265_s0, 32 }
 0x189   :  { %p3161_p7 = scmp.ne.s32.totalorder %s265_s0, %s3160_s4  ;;  %p3165_p8 = scmp.lt.s32.totalorder %s265_s0, %s265_s0 }
 0x18a   :  { %p3166_p9 = scmp.lt.s32.totalorder %s3164_s3, %s3160_s4 }
 0x18c   :  { %p3167_p10 = por %p3166_p9, %p3165_p8 }
 0x18e   :  { %p3168_p11 = pnand %p3167_p10, %p3161_p7 }
 0x190   :  { %3171 = shalt.err (!%p3168_p11)
}
 0x191   :  { %s3804_s8 = sld [smem:[#allocation58_spill]]  ;;  %s3314_s21 = smov [#allocation31]  }
 0x192   :  { %267 = dma.hbm_to_vmem [thread:$0]  %s3803_s6, 16, %s265_s0, [#allocation27]  }
 0x193   :  { %s286_s28 = sshll.u32 %s3314_s21, 4  ;;  %s3315_s14 = smov [#allocation34]   ;;  %s287_s28 = int_to_ptr.vmem [resolvable:$true] %s286_s28 }
 0x194   :  { %s308_s1 = sshll.u32 %s3315_s14, 4  ;;  %s309_s1 = int_to_ptr.vmem [resolvable:$true] %s308_s1 }
 0x197   :  { %s3172_s2 = scalar_lea.hbm %s3804_s8, 16 }
 0x198   :  { %p3173_p12 = scmp.ne.s32.totalorder %s3804_s8, %s3172_s2  ;;  %p3176_p13 = scmp.lt.u32.totalorder %s3172_s2, %s3804_s8 }
 0x19a   :  { %p3178_p0 = pnand %p3176_p13, %p3173_p12 }
 0x19c   :  { %3181 = shalt.err (!%p3178_p0)
}
 0x19d   :  { %s3182_s19 = scalar_lea.vmem %s287_s28, 16  ;;  %s3186_s7 = scalar_lea.vmem %s287_s28, 32 }
 0x19e   :  { %p3183_p1 = scmp.ne.s32.totalorder %s287_s28, %s3182_s19  ;;  %p3187_p2 = scmp.lt.s32.totalorder %s287_s28, %s287_s28 }
 0x19f   :  { %p3188_p3 = scmp.lt.s32.totalorder %s3186_s7, %s3182_s19 }
 0x1a1   :  { %p3189_p4 = por %p3188_p3, %p3187_p2 }
 0x1a3   :  { %p3190_p5 = pnand %p3189_p4, %p3183_p1 }
 0x1a5   :  { %3193 = shalt.err (!%p3190_p5)
}
 0x1a6   :  { %s3805_s5 = sld [smem:[#allocation59_spill]] }
 0x1a7   :  { %289 = dma.hbm_to_vmem [thread:$0]  %s3804_s8, 16, %s287_s28, [#allocation30]  }
 0x1ac   :  { %s3194_s10 = scalar_lea.hbm %s3805_s5, 16 }
 0x1ad   :  { %p3195_p6 = scmp.ne.s32.totalorder %s3805_s5, %s3194_s10  ;;  %p3198_p7 = scmp.lt.u32.totalorder %s3194_s10, %s3805_s5 }
 0x1af   :  { %p3200_p8 = pnand %p3198_p7, %p3195_p6 }
 0x1b1   :  { %3203 = shalt.err (!%p3200_p8)
}
 0x1b2   :  { %s3204_s11 = scalar_lea.vmem %s309_s1, 16  ;;  %s3208_s27 = scalar_lea.vmem %s309_s1, 32 }
 0x1b3   :  { %p3205_p9 = scmp.ne.s32.totalorder %s309_s1, %s3204_s11  ;;  %p3209_p10 = scmp.lt.s32.totalorder %s309_s1, %s309_s1 }
 0x1b4   :  { %p3210_p11 = scmp.lt.s32.totalorder %s3208_s27, %s3204_s11 }
 0x1b6   :  { %p3211_p12 = por %p3210_p11, %p3209_p10 }
 0x1b8   :  { %p3212_p13 = pnand %p3211_p12, %p3205_p9 }
 0x1ba   :  { %3215 = shalt.err (!%p3212_p13)
}
 0x1bb   :  { %s3806_s13 = sld [smem:[#allocation60_spill]]  ;;  %s3316_s16 = smov [#allocation35]  }
 0x1bc   :  { %311 = dma.hbm_to_vmem [thread:$0]  %s3805_s5, 16, %s309_s1, [#allocation33]  }
 0x1bd   :  { %s317_s18 = sshll.u32 %s3316_s16, 4  ;;  %s318_s18 = int_to_ptr.vmem [resolvable:$true] %s317_s18 }
 0x1c1   :  { %s3216_s22 = scalar_lea.hbm %s3806_s13, 2048 }
 0x1c2   :  { %p3217_p0 = scmp.ne.s32.totalorder %s3806_s13, %s3216_s22  ;;  %p3220_p1 = scmp.lt.u32.totalorder %s3216_s22, %s3806_s13 }
 0x1c4   :  { %p3222_p2 = pnand %p3220_p1, %p3217_p0 }
 0x1c6   :  { %3225 = shalt.err (!%p3222_p2)
}
 0x1c7   :  { %s3226_s20 = scalar_lea.vmem %s318_s18, 2048  ;;  %p3231_p4 = scmp.lt.s32.totalorder %s318_s18, %s318_s18 }
 0x1c8   :  { %p3227_p3 = scmp.ne.s32.totalorder %s318_s18, %s3226_s20  ;;  %p3232_p5 = scmp.lt.s32.totalorder %s3226_s20, %s3226_s20 }
 0x1ca   :  { %p3233_p6 = por %p3232_p5, %p3231_p4 }
 0x1cc   :  { %p3234_p7 = pnand %p3233_p6, %p3227_p3 }
 0x1ce   :  { %3237 = shalt.err (!%p3234_p7)
}
 0x1cf   :  { %323 = dma.hbm_to_vmem [thread:$0]  %s3806_s13, 2048, %s318_s18, [#allocation36], %s3300_s15, %s3300_s15, %s3301_s30  }
 0x1d0   :  { %3238 = dma.done.wait [#allocation4], 16  }
 0x1d1   :  { %3239 = vsyncadd [#allocation4], 4294967280 }
 0x1d2   :  { %3240 = dma.done.wait [#allocation6], 48  }
 0x1d3   :  { %3241 = vsyncadd [#allocation6], 4294967248 }
 0x1d4   :  { %3242 = dma.done.wait [#allocation9], 48  }
 0x1d5   :  { %3243 = vsyncadd [#allocation9], 4294967248 }
 0x1d6   :  { %3244 = dma.done.wait [#allocation12], 1040  }
 0x1d7   :  { %3245 = vsyncadd [#allocation12], 4294966256 }
 0x1d8   :  { %3246 = dma.done.wait [#allocation15], 1040  }
 0x1d9   :  { %3247 = vsyncadd [#allocation15], 4294966256 }
 0x1da   :  { %3248 = dma.done.wait [#allocation18], 32  }
 0x1db   :  { %3249 = vsyncadd [#allocation18], 4294967264 }
 0x1dc   :  { %3250 = dma.done.wait [#allocation21], 1040  }
 0x1dd   :  { %3251 = vsyncadd [#allocation21], 4294966256 }
 0x1de   :  { %3252 = dma.done.wait [#allocation24], 1040  }
 0x1df   :  { %3253 = vsyncadd [#allocation24], 4294966256 }
 0x1e0   :  { %3254 = dma.done.wait [#allocation27], 48  }
 0x1e1   :  { %3255 = vsyncadd [#allocation27], 4294967248 }
 0x1e2   :  { %3256 = dma.done.wait [#allocation30], 1040  }
 0x1e3   :  { %3257 = vsyncadd [#allocation30], 4294966256 }
 0x1e4   :  { %3258 = dma.done.wait [#allocation33], 1040  }
 0x1e5   :  { %3259 = vsyncadd [#allocation33], 4294966256 }
 0x1e6   :  { %3260 = dma.done.wait [#allocation36], 2048  }
 0x1e7   :  { %3261 = vsyncadd [#allocation36], 4294965248  ;;  %s3807_s15 = sld [smem:[#allocation49_spill]]  ;;  %v3317_v1 = vmov 0   ;;  %v405_v2 = vlaneseq  ;;  %v2133_v6 = vld [vmem:[#allocation3] ss:$0 sm:$0xff] }
 0x1e8   :  { %2654 = vset.pattern.permute.xlu0 %v3317_v1  ;;  %s3808_s30 = sld [smem:[#allocation50_spill]]  ;;  %v3318_v7 = vmov 0.0   ;;  %vm3319_vm1 = vmmov 0   ;;  %vm515_vm2 = vcmask 1041408   ;;  %v503_v10 = vld [vmem:[#allocation7] sm:$0x3] }
 0x1e9   :  { %v3596_v5 = vshrl.u32 %v405_v2, 7  ;;  %2388 = vmatprep.subr.bf16.mxu0 %v3318_v7  ;;  %2394 = vmatprep.subr.bf16.mxu1 %v3318_v7  ;;  %vm511_vm3 = vcmask 31744   ;;  %s3320_s9 = smov 8   ;;  %v517_v11 = vsel %vm515_vm2, %v503_v10, 0  ;;  %v2656_v13 = vld [vmem:[#allocation13] sm:$0xff]   ;;  %v2657_v14 = vld [vmem:[#allocation13 + $0x8] sm:$0xff]  }
 0x1ea   :  { %2390 = vmatprep.mubr.msk.bf16.mxu0 %vm3319_vm1, %v3318_v7  ;;  %2396 = vmatprep.mubr.msk.bf16.mxu1 %vm3319_vm1, %v3318_v7  ;;  %v2658_v15 = vld [vmem:[#allocation13 + $0x10] sm:$0xff]   ;;  %v2659_v16 = vld [vmem:[#allocation13 + $0x18] sm:$0xff]   ;;  %s3809_s0 = sld [smem:[#allocation51_spill]]  ;;  %v406_v18 = vand.u32 127, %v405_v2  ;;  %v3321_v21 = vmov 1.0|1.0  }
 0x1eb   :  { %vm426_vm0 = vcmp.eq.s32.totalorder %v3596_v5, %v2133_v6  ;;  %2395 = vmatpush3.bf16.msra.mxu1 %v517_v11  ;;  %v559_v20 = vld [vmem:[#allocation10] sm:$0x3]  ;;  %vm430_vm7 = vcmask 130048   ;;  %v2660_v24 = vld [vmem:[#allocation13 + $0x20] sm:$0xff]   ;;  %v2661_v25 = vld [vmem:[#allocation13 + $0x28] sm:$0xff]   ;;  %s3810_s29 = sld [smem:[#allocation53_spill]] }
 0x1ec   :  { %v2134_v8 = vsel %vm426_vm0, 1.0, %v3318_v7  ;;  %2406 = vmatprep.subr.bf16.mxu1 %v3318_v7  ;;  %v576_v22 = vsel %vm515_vm2, %v559_v20, 0  ;;  %v2662_v26 = vld [vmem:[#allocation13 + $0x30] sm:$0xff]   ;;  %v2663_v27 = vld [vmem:[#allocation13 + $0x38] sm:$0xff]   ;;  %v2664_v29 = vld [vmem:[#allocation16] sm:$0xff]   ;;  %vm851_vm8 = vcmask 1043456  }
 0x1ed   :  { %v401_v3 = vld [vmem:[%s3807_s15] sm:$0xff]  ;;  %v402_v4 = vld [vmem:[%s3807_s15 + $0x8] sm:$0xff]  ;;  %v429_v9 = vpack.c.bf16 %v2134_v8, %v2134_v8  ;;  %v2665_v32 = vld [vmem:[#allocation16 + $0x8] sm:$0xff]   ;;  %vm478_vm9 = vcmask 64512   ;;  %vm856_vm10 = vcmask 195584   ;;  %s3811_s25 = sld [smem:[#allocation62_spill]] }
 0x1ee   :  { %408 = vperm.xlu0 %2654, %v401_v3   ;;  %v502_v12 = vld [vmem:[%s3808_s30] sm:$0xf]  ;;  %v2667_v35 = vld [vmem:[#allocation16 + $0x18] sm:$0xff]   ;;  %v2668_v36 = vld [vmem:[#allocation16 + $0x20] sm:$0xff]   ;;  %s3812_s23 = sld [smem:[#allocation61_spill]]  ;;  %vm489_vm11 = vcmask 58368  }
 0x1ef   :  { %476 = vrot.lane.b32.xlu1 %v429_v9, %s3320_s9  ;;  %2397 = vmatmul.mubr.msk.bf16.vlgmr.msra.gmra.mrb[0].mxu1 %vm511_vm3, %v502_v12  ;;  %v2666_v34 = vld [vmem:[#allocation16 + $0x10] sm:$0xff]   ;;  %v2669_v37 = vld [vmem:[#allocation16 + $0x28] sm:$0xff]   ;;  %v2142_v42 = vld [vmem:[#allocation11] ss:$0 sm:$0xff]  ;;  %vm2082_vm14 = vcmask 1024  }
 0x1f0   :  { %2407 = vmatpush3.bf16.msra.mxu1 %v2656_v13  ;;  %2422 = vmatprep.mubr.msk.bf16.mxu1 %vm3319_vm1, %v3318_v7  ;;  %v3622_v23 = vld [vmem:[%s3809_s0] sm:$0xff]   ;;  %v2145_v52 = vld [vmem:[#allocation14] ss:$0 sm:$0xff]  ;;  %v2154_v63 = vld [vmem:[#allocation17] ss:$0 sm:$0xff] }
 0x1f1   :  { %2408 = vmatprep.subr.bf16.mxu1 %v3318_v7  ;;  %v2670_v50 = vld [vmem:[#allocation16 + $0x30] sm:$0xff]   ;;  %v2671_v51 = vld [vmem:[#allocation16 + $0x38] sm:$0xff]  }
 0x1f2   :  { %411 = vperm.xlu0 %2654, %v402_v4   ;;  %v2140_v62 = vld [vmem:[#allocation8] ss:$0 sm:$0xff]  ;;  %v2675_v20 = vld [vmem:[%s3810_s29 + $0x8] sm:$0xff]  }
 0x1f3   :  { %v2672_v13 = vld [vmem:[%s3810_s29 + $0x40] sm:$0xff]  }
 0x1f4   :  { %2409 = vmatpush3.bf16.msra.mxu1 %v2657_v14 }
 0x1f5   :  { %2410 = vmatprep.subr.bf16.mxu1 %v3318_v7 }
 0x1f8   :  { %2411 = vmatpush3.bf16.msra.mxu1 %v2658_v15 }
 0x1f9   :  { %2412 = vmatprep.subr.bf16.mxu1 %v3318_v7 }
 0x1fc   :  { %2413 = vmatpush3.bf16.msra.mxu1 %v2659_v16 }
 0x1fd   :  { %2414 = vmatprep.subr.bf16.mxu1 %v3318_v7 }
 0x200   :  { %2415 = vmatpush3.bf16.msra.mxu1 %v2660_v24  ;;  %v2678_v24 = vld [vmem:[%s3810_s29 + $0x58] sm:$0xff]  }
 0x201   :  { %2416 = vmatprep.subr.bf16.mxu1 %v3318_v7 }
 0x204   :  { %2417 = vmatpush3.bf16.msra.mxu1 %v2661_v25  ;;  %v2679_v25 = vld [vmem:[%s3810_s29 + $0x18] sm:$0xff]  }
 0x205   :  { %2418 = vmatprep.subr.bf16.mxu1 %v3318_v7 }
 0x208   :  { %2419 = vmatpush3.bf16.msra.mxu1 %v2662_v26  ;;  %v2680_v26 = vld [vmem:[%s3810_s29 + $0x60] sm:$0xff]  }
 0x209   :  { %2420 = vmatprep.subr.bf16.mxu1 %v3318_v7 }
 0x20c   :  { %2421 = vmatpush3.bf16.msra.mxu1 %v2663_v27  ;;  %v2681_v27 = vld [vmem:[%s3810_s29 + $0x20] sm:$0xff]  }
 0x20d   :  { %2454 = vmatprep.subr.bf16.mxu1 %v3318_v7 }
 0x261   :  { %v477_v15 = vpop.permute.xlu1 %476 }
 0x26d   :  { %v409_v17 = vpop.permute.xlu0 %408 }
 0x26e   :  { %vm413_vm4 = vcmp.eq.s32.totalorder %v406_v18, %v409_v17  ;;  %v2673_v17 = vld [vmem:[%s3810_s29] sm:$0xff]  }
 0x271   :  { %v412_v19 = vpop.permute.xlu0 %411 }
 0x272   :  { %vm414_vm5 = vcmp.eq.s32.totalorder %v406_v18, %v412_v19  ;;  %v2674_v18 = vld [vmem:[%s3810_s29 + $0x48] sm:$0xff]  }
 0x273   :  { %vm2135_vm6 = vmpackc.low %vm414_vm5, %vm413_vm4 }
 0x274   :  { %2389 = vmatpush3.bf16.msk.msra.mxu0 %vm2135_vm6, %v3321_v21  ;;  %v2676_v21 = vld [vmem:[%s3810_s29 + $0x50] sm:$0xff]  }
 0x275   :  { %2400 = vmatprep.subr.bf16.mxu0 %v3318_v7 }
 0x277   :  { %2391 = vmatmul.mubr.msk.bf16.vlgmr.msra.gmra.mrb[0].mxu0 %vm430_vm7, %v429_v9 }
 0x278   :  { %2401 = vmatpush3.bf16.msra.mxu0 %v576_v22  ;;  %2402 = vmatprep.mubr.msk.bf16.mxu0 %vm3319_vm1, %v3318_v7  ;;  %v2677_v22 = vld [vmem:[%s3810_s29 + $0x10] sm:$0xff]  }
 0x279   :  { %2426 = vmatprep.subr.bf16.mxu0 %v3318_v7 }
 0x27f   :  { %2403 = vmatmul.mubr.msk.bf16.vlgmr.msra.gmra.mrb[4].mxu0 %vm511_vm3, %v3622_v23 }
 0x280   :  { %2442 = vmatprep.mubr.msk.bf16.mxu0 %vm3319_vm1, %v3318_v7  ;;  %2427 = vmatpush3.bf16.msra.mxu0 %v2664_v29  ;;  %v2683_v29 = vld [vmem:[%s3810_s29 + $0x28] sm:$0xff]  }
 0x281   :  { %2428 = vmatprep.subr.bf16.mxu0 %v3318_v7 }
 0x284   :  { %2429 = vmatpush3.bf16.msra.mxu0 %v2665_v32  ;;  %v2686_v32 = vld [vmem:[%s3810_s29 + $0x78] sm:$0xff]  }
 0x285   :  { %2430 = vmatprep.subr.bf16.mxu0 %v3318_v7 }
 0x288   :  { %2431 = vmatpush3.bf16.msra.mxu0 %v2666_v34  ;;  %v2688_v34 = vld [vmem:[#allocation20] sm:$0xff]  }
 0x289   :  { %2432 = vmatprep.subr.bf16.mxu0 %v3318_v7 }
 0x28c   :  { %2433 = vmatpush3.bf16.msra.mxu0 %v2667_v35  ;;  %v2689_v35 = vld [vmem:[#allocation20 + $0x8] sm:$0xff]  }
 0x28d   :  { %2434 = vmatprep.subr.bf16.mxu0 %v3318_v7 }
 0x290   :  { %2435 = vmatpush3.bf16.msra.mxu0 %v2668_v36  ;;  %v2690_v36 = vld [vmem:[#allocation20 + $0x10] sm:$0xff]  }
 0x291   :  { %2436 = vmatprep.subr.bf16.mxu0 %v3318_v7 }
 0x294   :  { %2437 = vmatpush3.bf16.msra.mxu0 %v2669_v37  ;;  %v2691_v37 = vld [vmem:[#allocation20 + $0x18] sm:$0xff]  }
 0x295   :  { %2438 = vmatprep.subr.bf16.mxu0 %v3318_v7 }
 0x298   :  { %2439 = vmatpush3.bf16.msra.mxu0 %v2670_v50  ;;  %v2700_v50 = vld [vmem:[#allocation23 + $0x18] sm:$0xff]  }
 0x299   :  { %2440 = vmatprep.subr.bf16.mxu0 %v3318_v7 }
 0x29c   :  { %2441 = vmatpush3.bf16.msra.mxu0 %v2671_v51  ;;  %v2702_v51 = vld [vmem:[#allocation23 + $0x20] sm:$0xff]  }
 0x29d   :  { %2446 = vmatprep.subr.bf16.mxu0 %v3318_v7 }
 0x2c2   :  { %v553_v28 = vpop.f32.mrb[0].mxu1 }
 0x2c3   :  { %v2398_v30 = vpop.f32.mrb[1].mxu1  ;;  %v554_v3 = vadd.f32 %v2140_v62, %v553_v28  ;;  %v2682_v28 = vld [vmem:[%s3810_s29 + $0x68] sm:$0xff]  }
 0x2c4   :  { %v556_v31 = vpop.f32.mrb[2].mxu1  ;;  %v2684_v30 = vld [vmem:[%s3810_s29 + $0x70] sm:$0xff]  }
 0x2c5   :  { %v2399_v33 = vpop.f32.mrb[3].mxu1  ;;  %v3644_v10 = vpack.c.bf16 %v554_v3, %v554_v3  ;;  %v2685_v31 = vld [vmem:[%s3810_s29 + $0x30] sm:$0xff]  }
 0x2c6   :  { %v2687_v33 = vld [vmem:[%s3810_s29 + $0x38] sm:$0xff]  }
 0x2c7   :  { %v2705_v3 = vld [vmem:[#allocation29 + $0x18] sm:$0xff]  }
 0x34a   :  { %v468_v38 = vpop.f32.mrb[0].mxu0 }
 0x34b   :  { %v2392_v39 = vpop.f32.mrb[1].mxu0  ;;  %v474_v14 = vpack.c.bf16 %v468_v38, %v468_v38  ;;  %v2692_v38 = vld [vmem:[#allocation20 + $0x20] sm:$0xff]  }
 0x34c   :  { %v471_v40 = vpop.f32.mrb[2].mxu0  ;;  %v2693_v39 = vld [vmem:[#allocation20 + $0x28] sm:$0xff]  }
 0x34d   :  { %v2393_v41 = vpop.f32.mrb[3].mxu0  ;;  %v3654_v19 = vsel %vm478_vm9, %v474_v14, %v477_v15 }
 0x352   :  { %v612_v43 = vpop.f32.mrb[4].mxu0 }
 0x353   :  { %v2404_v44 = vpop.f32.mrb[5].mxu0  ;;  %v613_v46 = vadd.f32 %v2142_v42, %v612_v43 }
 0x354   :  { %v615_v45 = vpop.f32.mrb[6].mxu0 }
 0x355   :  { %v616_v47 = vadd.f32 %v2142_v42, %v615_v45  ;;  %v2405_v48 = vpop.f32.mrb[7].mxu0  ;;  %v2694_v45 = vld [vmem:[#allocation20 + $0x30] sm:$0xff]  }
 0x356   :  { %v2697_v48 = vld [vmem:[#allocation23 + $0x8] sm:$0xff]  }
 0x357   :  { %v619_v49 = vpack.c.bf16 %v616_v47, %v613_v46  ;;  %v2695_v46 = vld [vmem:[#allocation20 + $0x38] sm:$0xff]   ;;  %v2696_v47 = vld [vmem:[#allocation23] sm:$0xff]  }
 0x359   :  { %2423 = vmatmul.mubr.bf16.vlgmr.msra.gmra.mrb[4].mxu1 %v619_v49  ;;  %v2698_v49 = vld [vmem:[#allocation23 + $0x10] sm:$0xff]  }
 0x35a   :  { %2470 = vmatprep.mubr.msk.bf16.mxu1 %vm3319_vm1, %v3318_v7  ;;  %2455 = vmatpush3.bf16.msra.mxu1 %v2688_v34  ;;  %v2717_v34 = vld [vmem:[#allocation32 + $0x28] sm:$0xff]  }
 0x35b   :  { %2456 = vmatprep.subr.bf16.mxu1 %v3318_v7 }
 0x35e   :  { %2457 = vmatpush3.bf16.msra.mxu1 %v2689_v35  ;;  %v2718_v35 = vld [vmem:[#allocation32 + $0x30] sm:$0xff]  }
 0x35f   :  { %2458 = vmatprep.subr.bf16.mxu1 %v3318_v7 }
 0x362   :  { %2459 = vmatpush3.bf16.msra.mxu1 %v2690_v36  ;;  %v2719_v36 = vld [vmem:[#allocation32 + $0x38] sm:$0xff]  }
 0x363   :  { %2460 = vmatprep.subr.bf16.mxu1 %v3318_v7 }
 0x366   :  { %2461 = vmatpush3.bf16.msra.mxu1 %v2691_v37 }
 0x367   :  { %2462 = vmatprep.subr.bf16.mxu1 %v3318_v7 }
 0x36a   :  { %2463 = vmatpush3.bf16.msra.mxu1 %v2692_v38 }
 0x36b   :  { %2464 = vmatprep.subr.bf16.mxu1 %v3318_v7 }
 0x36e   :  { %2465 = vmatpush3.bf16.msra.mxu1 %v2693_v39 }
 0x36f   :  { %2466 = vmatprep.subr.bf16.mxu1 %v3318_v7 }
 0x372   :  { %2467 = vmatpush3.bf16.msra.mxu1 %v2694_v45 }
 0x373   :  { %2468 = vmatprep.subr.bf16.mxu1 %v3318_v7 }
 0x376   :  { %2469 = vmatpush3.bf16.msra.mxu1 %v2695_v46 }
 0x377   :  { %2494 = vmatprep.subr.bf16.mxu1 %v3318_v7 }
 0x42c   :  { %v725_v53 = vpop.f32.mrb[4].mxu1 }
 0x42d   :  { %v726_v54 = vadd.f32 %v2145_v52, %v725_v53  ;;  %v2424_v55 = vpop.f32.mrb[5].mxu1 }
 0x42e   :  { %v728_v56 = vpop.f32.mrb[6].mxu1 }
 0x42f   :  { %v729_v57 = vadd.f32 %v2145_v52, %v728_v56  ;;  %v2425_v58 = vpop.f32.mrb[7].mxu1  ;;  %v732_v59 = vmax.f32 %v726_v54, 0.0  ;;  %v2704_v52 = vld [vmem:[#allocation23 + $0x28] sm:$0xff]   ;;  %v2164_v54 = vld [vmem:[#allocation19] ss:$0 sm:$0xff] }
 0x431   :  { %v733_v60 = vmax.f32 %v729_v57, 0.0 }
 0x433   :  { %v734_v61 = vpack.c.bf16 %v733_v60, %v732_v59  ;;  %v1303_v60 = vld [vmem:[#allocation26] sm:$0x3] }
 0x435   :  { %2443 = vmatmul.mubr.bf16.vlgmr.msra.gmra.mrb[8].mxu0 %v734_v61 }
 0x436   :  { %2450 = vmatprep.mubr.msk.bf16.mxu0 %vm3319_vm1, %v3318_v7 }
 0x508   :  { %v840_v0 = vpop.f32.mrb[8].mxu0 }
 0x509   :  { %v2444_v1 = vpop.f32.mrb[9].mxu0  ;;  %v841_v4 = vadd.f32 %v2154_v63, %v840_v0  ;;  %v2699_v0 = vld [vmem:[#allocation29] sm:$0xff]  }
 0x50a   :  { %v843_v2 = vpop.f32.mrb[10].mxu0  ;;  %v2701_v1 = vld [vmem:[#allocation29 + $0x8] sm:$0xff]  }
 0x50b   :  { %v844_v6 = vadd.f32 %v2154_v63, %v843_v2  ;;  %v2445_v8 = vpop.f32.mrb[11].mxu0  ;;  %v1312_v63 = vsel %vm515_vm2, %v1303_v60, 0  ;;  %v2703_v2 = vld [vmem:[#allocation29 + $0x10] sm:$0xff]  }
 0x50c   :  { %v2709_v8 = vld [vmem:[#allocation29 + $0x28] sm:$0xff]  }
 0x50d   :  { %v848_v9 = vpack.c.bf16 %v844_v6, %v841_v4  ;;  %v2706_v4 = vld [vmem:[#allocation23 + $0x30] sm:$0xff]   ;;  %v2708_v6 = vld [vmem:[#allocation23 + $0x38] sm:$0xff]  }
 0x50f   :  { %v850_v11 = vrot.slane %v848_v9, 4  ;;  %v2710_v9 = vld [vmem:[#allocation29 + $0x30] sm:$0xff]  }
 0x511   :  { %v854_v12 = vsel %vm851_vm8, %v3644_v10, %v850_v11  ;;  %v859_v16 = vsel %vm851_vm8, %v850_v11, 0  ;;  %v2181_v11 = vld [vmem:[#allocation22] ss:$0 sm:$0xff] }
 0x512   :  { %2447 = vmatpush3.bf16.msra.mxu0 %v854_v12 }
 0x513   :  { %2448 = vmatprep.subr.bf16.mxu0 %v3318_v7 }
 0x516   :  { %2449 = vmatpush3.bf16.msra.mxu0 %v859_v16 }
 0x517   :  { %2283 = vmatprep.subr.bf16.mxu0 %v2672_v13 }
 0x519   :  { %2451 = vmatmul.mubr.msk.bf16.vlgmr.msra.gmra.mrb[12].mxu0 %vm856_vm10, %v3654_v19 }
 0x51a   :  { %2284 = vmatpush3.bf16.msra.mxu0 %v2673_v17 }
 0x51b   :  { %2285 = vmatprep.subr.bf16.mxu0 %v2674_v18  ;;  %v2712_v18 = vld [vmem:[#allocation32] sm:$0xff]  }
 0x51e   :  { %2286 = vmatpush3.bf16.msra.mxu0 %v2675_v20 }
 0x51f   :  { %2287 = vmatprep.subr.bf16.mxu0 %v2676_v21  ;;  %v2199_v21 = vld [vmem:[#allocation28] ss:$0 sm:$0xff] }
 0x522   :  { %2288 = vmatpush3.bf16.msra.mxu0 %v2677_v22 }
 0x523   :  { %2289 = vmatprep.subr.bf16.mxu0 %v2678_v24  ;;  %v2713_v24 = vld [vmem:[#allocation32 + $0x8] sm:$0xff]  }
 0x526   :  { %2290 = vmatpush3.bf16.msra.mxu0 %v2679_v25 }
 0x527   :  { %2291 = vmatprep.subr.bf16.mxu0 %v2680_v26 }
 0x52a   :  { %2292 = vmatpush3.bf16.msra.mxu0 %v2681_v27 }
 0x52b   :  { %2293 = vmatprep.subr.bf16.mxu0 %v2682_v28 }
 0x52e   :  { %2294 = vmatpush3.bf16.msra.mxu0 %v2683_v29 }
 0x52f   :  { %2295 = vmatprep.subr.bf16.mxu0 %v2684_v30  ;;  %v2714_v30 = vld [vmem:[#allocation32 + $0x10] sm:$0xff]  }
 0x532   :  { %2296 = vmatpush3.bf16.msra.mxu0 %v2685_v31 }
 0x533   :  { %2297 = vmatprep.subr.bf16.mxu0 %v2686_v32  ;;  %v2715_v32 = vld [vmem:[#allocation32 + $0x18] sm:$0xff]  }
 0x536   :  { %2298 = vmatpush3.bf16.msra.mxu0 %v2687_v33  ;;  %v2716_v33 = vld [vmem:[#allocation32 + $0x20] sm:$0xff]  }
 0x537   :  { %2474 = vmatprep.subr.bf16.mxu0 %v3318_v7 }
 0x5ec   :  { %v895_v40 = vpop.f32.mrb[12].mxu0 }
 0x5ed   :  { %v901_v41 = vpack.c.bf16 %v895_v40, %v895_v40  ;;  %v2452_v42 = vpop.f32.mrb[13].mxu0 }
 0x5ee   :  { %v898_v43 = vpop.f32.mrb[14].mxu0 }
 0x5ef   :  { %v2453_v44 = vpop.f32.mrb[15].mxu0  ;;  %1069 = vmatprep.mubr.bf16.mxu0 %v901_v41  ;;  %v2201_v41 = vld [vmem:[#allocation31] ss:$0 sm:$0xff] }
 0x5f0   :  { %1070 = vmatmul.mubr.bf16.vlgmr.msra.gmra.mrb[16].mxu0 %v3644_v10  ;;  %v2711_v10 = vld [vmem:[#allocation29 + $0x38] sm:$0xff]  }
 0x5f1   :  { %2490 = vmatprep.mubr.msk.bf16.mxu0 %vm3319_vm1, %v3318_v7  ;;  %2475 = vmatpush3.bf16.msra.mxu0 %v2696_v47 }
 0x5f2   :  { %2476 = vmatprep.subr.bf16.mxu0 %v3318_v7 }
 0x5f5   :  { %2477 = vmatpush3.bf16.msra.mxu0 %v2697_v48 }
 0x5f6   :  { %2478 = vmatprep.subr.bf16.mxu0 %v3318_v7 }
 0x5f9   :  { %2479 = vmatpush3.bf16.msra.mxu0 %v2698_v49 }
 0x5fa   :  { %2480 = vmatprep.subr.bf16.mxu0 %v3318_v7 }
 0x5fd   :  { %2481 = vmatpush3.bf16.msra.mxu0 %v2700_v50 }
 0x5fe   :  { %2482 = vmatprep.subr.bf16.mxu0 %v3318_v7 }
 0x601   :  { %2483 = vmatpush3.bf16.msra.mxu0 %v2702_v51  ;;  %v2190_v51 = vld [vmem:[#allocation25] ss:$0 sm:$0xff] }
 0x602   :  { %2484 = vmatprep.subr.bf16.mxu0 %v3318_v7 }
 0x605   :  { %2485 = vmatpush3.bf16.msra.mxu0 %v2704_v52  ;;  %v2210_v52 = vld [vmem:[#allocation34] ss:$0 sm:$0xff] }
 0x606   :  { %2486 = vmatprep.subr.bf16.mxu0 %v3318_v7 }
 0x609   :  { %2487 = vmatpush3.bf16.msra.mxu0 %v2706_v4  ;;  %v2723_v4 = vld [vmem:[#allocation35 + $0x8] sm:$0xff]  }
 0x60a   :  { %2488 = vmatprep.subr.bf16.mxu0 %v3318_v7 }
 0x60d   :  { %2489 = vmatpush3.bf16.msra.mxu0 %v2708_v6  ;;  %v2725_v6 = vld [vmem:[#allocation35 + $0x10] sm:$0xff]  }
 0x60e   :  { %2520 = vmatprep.subr.bf16.mxu0 %v3318_v7 }
 0x6c3   :  { %v2299_v53 = vpop.f32.mrb[16].mxu0 }
 0x6c4   :  { %v2300_v55 = vpop.f32.mrb[17].mxu0 }
 0x6c5   :  { %v2301_v56 = vadd.f32 %v2300_v55, %v2299_v53  ;;  %v2302_v57 = vpop.f32.mrb[18].mxu0 }
 0x6c6   :  { %v2303_v58 = vpop.f32.mrb[19].mxu0 }
 0x6c7   :  { %v1072_v59 = vadd.f32 %v2301_v56, %v2164_v54 }
 0x6c9   :  { %v1077_v61 = vmax.f32 %v1072_v59, 0.0 }
 0x6cb   :  { %v1078_v62 = vpack.c.bf16 %v1077_v61, %v1077_v61 }
 0x6cd   :  { %2471 = vmatmul.mubr.bf16.vlgmr.msra.gmra.mrb[8].mxu1 %v1078_v62 }
 0x6ce   :  { %2495 = vmatpush3.bf16.msra.mxu1 %v1312_v63  ;;  %2496 = vmatprep.mubr.msk.bf16.mxu1 %vm3319_vm1, %v3318_v7 }
 0x6cf   :  { %2500 = vmatprep.subr.bf16.mxu1 %v3318_v7 }
 0x6d5   :  { %2497 = vmatmul.mubr.msk.bf16.vlgmr.msra.gmra.mrb[12].mxu1 %vm511_vm3, %v3622_v23  ;;  %v2707_v23 = vld [vmem:[#allocation29 + $0x20] sm:$0xff]  }
 0x6d6   :  { %2501 = vmatpush3.bf16.msra.mxu1 %v2699_v0  ;;  %2516 = vmatprep.mubr.msk.bf16.mxu1 %vm3319_vm1, %v3318_v7  ;;  %v2720_v0 = vld [vmem:[#allocation35 + $0x40] sm:$0xff]  }
 0x6d7   :  { %2502 = vmatprep.subr.bf16.mxu1 %v3318_v7 }
 0x6da   :  { %2503 = vmatpush3.bf16.msra.mxu1 %v2701_v1 }
 0x6db   :  { %2504 = vmatprep.subr.bf16.mxu1 %v3318_v7 }
 0x6de   :  { %2505 = vmatpush3.bf16.msra.mxu1 %v2703_v2  ;;  %v2721_v2 = vld [vmem:[#allocation35] sm:$0xff]  }
 0x6df   :  { %2506 = vmatprep.subr.bf16.mxu1 %v3318_v7 }
 0x6e2   :  { %2507 = vmatpush3.bf16.msra.mxu1 %v2705_v3  ;;  %v2722_v3 = vld [vmem:[#allocation35 + $0x48] sm:$0xff]  }
 0x6e3   :  { %2508 = vmatprep.subr.bf16.mxu1 %v3318_v7 }
 0x6e6   :  { %2509 = vmatpush3.bf16.msra.mxu1 %v2707_v23  ;;  %v2724_v23 = vld [vmem:[#allocation35 + $0x50] sm:$0xff]  }
 0x6e7   :  { %2510 = vmatprep.subr.bf16.mxu1 %v3318_v7 }
 0x6ea   :  { %2511 = vmatpush3.bf16.msra.mxu1 %v2709_v8  ;;  %v2726_v8 = vld [vmem:[#allocation35 + $0x58] sm:$0xff]  }
 0x6eb   :  { %2512 = vmatprep.subr.bf16.mxu1 %v3318_v7 }
 0x6ee   :  { %2513 = vmatpush3.bf16.msra.mxu1 %v2710_v9  ;;  %v2727_v9 = vld [vmem:[#allocation35 + $0x18] sm:$0xff]  }
 0x6ef   :  { %2514 = vmatprep.subr.bf16.mxu1 %v3318_v7 }
 0x6f2   :  { %2515 = vmatpush3.bf16.msra.mxu1 %v2711_v10  ;;  %v2728_v10 = vld [vmem:[#allocation35 + $0x60] sm:$0xff]  }
 0x6f3   :  { %2540 = vmatprep.subr.bf16.mxu1 %v3318_v7 }
 0x7a0   :  { %v1184_v12 = vpop.f32.mrb[8].mxu1 }
 0x7a1   :  { %v1185_v13 = vadd.f32 %v2181_v11, %v1184_v12  ;;  %v2472_v14 = vpop.f32.mrb[9].mxu1  ;;  %v2729_v11 = vld [vmem:[#allocation35 + $0x20] sm:$0xff]   ;;  %v2730_v12 = vld [vmem:[#allocation35 + $0x68] sm:$0xff]  }
 0x7a2   :  { %v1187_v15 = vpop.f32.mrb[10].mxu1  ;;  %v2733_v14 = vld [vmem:[#allocation35 + $0x30] sm:$0xff]  }
 0x7a3   :  { %v1190_v16 = vmax.f32 %v1185_v13, 0.0  ;;  %v2473_v17 = vpop.f32.mrb[11].mxu1  ;;  %v2732_v13 = vld [vmem:[#allocation35 + $0x70] sm:$0xff]   ;;  %v2734_v15 = vld [vmem:[#allocation35 + $0x78] sm:$0xff]  }
 0x7a4   :  { %v2736_v17 = vld [vmem:[%s3811_s25] sm:$0xff]  }
 0x7a5   :  { %v1191_v20 = vpack.c.bf16 %v1190_v16, %v1190_v16  ;;  %v2735_v16 = vld [vmem:[#allocation35 + $0x38] sm:$0xff]  }
 0x7a7   :  { %2491 = vmatmul.mubr.bf16.vlgmr.msra.gmra.mrb[20].mxu0 %v1191_v20  ;;  %v2738_v20 = vld [vmem:[%s3811_s25 + $0x10] sm:$0xff]  }
 0x7a8   :  { %v1348_v22 = vpop.f32.mrb[12].mxu1  ;;  %2521 = vmatpush3.bf16.msra.mxu0 %v2712_v18  ;;  %2536 = vmatprep.mubr.msk.bf16.mxu0 %vm3319_vm1, %v3318_v7  ;;  %v2737_v18 = vld [vmem:[%s3811_s25 + $0x8] sm:$0xff]  }
 0x7a9   :  { %v2498_v25 = vpop.f32.mrb[13].mxu1  ;;  %2522 = vmatprep.subr.bf16.mxu0 %v3318_v7  ;;  %v1349_v27 = vadd.f32 %v2199_v21, %v1348_v22  ;;  %v2740_v22 = vld [vmem:[%s3811_s25 + $0x20] sm:$0xff]  }
 0x7aa   :  { %v1351_v26 = vpop.f32.mrb[14].mxu1 }
 0x7ab   :  { %v1352_v28 = vadd.f32 %v2199_v21, %v1351_v26  ;;  %v2499_v29 = vpop.f32.mrb[15].mxu1  ;;  %v2739_v21 = vld [vmem:[%s3811_s25 + $0x18] sm:$0xff]  }
 0x7ac   :  { %2523 = vmatpush3.bf16.msra.mxu0 %v2713_v24  ;;  %v2741_v24 = vld [vmem:[%s3811_s25 + $0x28] sm:$0xff]  }
 0x7ad   :  { %v1355_v31 = vpack.c.bf16 %v1352_v28, %v1349_v27  ;;  %2524 = vmatprep.subr.bf16.mxu0 %v3318_v7 }
 0x7af   :  { %2517 = vmatmul.mubr.bf16.vlgmr.msra.gmra.mrb[16].mxu1 %v1355_v31  ;;  %v2743_v31 = vld [vmem:[%s3811_s25 + $0x38] sm:$0xff]  }
 0x7b0   :  { %2525 = vmatpush3.bf16.msra.mxu0 %v2714_v30  ;;  %2544 = vmatprep.mubr.msk.bf16.mxu1 %vm3319_vm1, %v3318_v7  ;;  %v2742_v30 = vld [vmem:[%s3811_s25 + $0x30] sm:$0xff]  }
 0x7b1   :  { %2526 = vmatprep.subr.bf16.mxu0 %v3318_v7 }
 0x7b4   :  { %2527 = vmatpush3.bf16.msra.mxu0 %v2715_v32  ;;  %v2138_v32 = vld [vmem:[#allocation5] ss:$0 sm:$0xff] }
 0x7b5   :  { %2528 = vmatprep.subr.bf16.mxu0 %v3318_v7  ;;  %vm486_vm12 = vcmp.eq.s32.totalorder %v3596_v5, %v2138_v32  ;;  %v2237_v5 = vld [vmem:[%s3470_s17] ss:$0 sm:$0xff] }
 0x7b8   :  { %2529 = vmatpush3.bf16.msra.mxu0 %v2716_v33  ;;  %v2139_v33 = vsel %vm486_vm12, 1.0, %v3318_v7 }
 0x7b9   :  { %2530 = vmatprep.subr.bf16.mxu0 %v3318_v7 }
 0x7bc   :  { %2531 = vmatpush3.bf16.msra.mxu0 %v2717_v34  ;;  %v490_v34 = vsel %vm489_vm11, %v2139_v33, 0.0 }
 0x7bd   :  { %2532 = vmatprep.subr.bf16.mxu0 %v3318_v7  ;;  %491 = vadd.xlane.f32.xlu1 %v490_v34 }
 0x7c0   :  { %2533 = vmatpush3.bf16.msra.mxu0 %v2718_v35 }
 0x7c1   :  { %2534 = vmatprep.subr.bf16.mxu0 %v3318_v7 }
 0x7c4   :  { %2535 = vmatpush3.bf16.msra.mxu0 %v2719_v36  ;;  %v2220_v36 = vld [vmem:[%s3812_s23] ss:$0 sm:$0xff] }
 0x7c5   :  { %2548 = vmatprep.subr.bf16.mxu0 %v3318_v7 }
 0x87a   :  { %v1297_v37 = vpop.f32.mrb[20].mxu0 }
 0x87b   :  { %v2492_v38 = vpop.f32.mrb[21].mxu0  ;;  %v1298_v56 = vadd.f32 %v2190_v51, %v1297_v37 }
 0x87c   :  { %v1300_v39 = vpop.f32.mrb[22].mxu0 }
 0x87d   :  { %v2493_v40 = vpop.f32.mrb[23].mxu0  ;;  %v3721_v61 = vpack.c.bf16 %v1298_v56, %v1298_v56 }
 0x882   :  { %v1461_v42 = vpop.f32.mrb[16].mxu1 }
 0x883   :  { %v1462_v43 = vadd.f32 %v2201_v41, %v1461_v42  ;;  %v2518_v44 = vpop.f32.mrb[17].mxu1 }
 0x884   :  { %v1464_v45 = vpop.f32.mrb[18].mxu1  ;;  %v492_v44 = vpop.xlane.xlu1 %491 }
 0x885   :  { %v1465_v46 = vadd.f32 %v2201_v41, %v1464_v45  ;;  %v2519_v47 = vpop.f32.mrb[19].mxu1  ;;  %v1468_v48 = vmax.f32 %v1462_v43, 0.0  ;;  %v494_v45 = vmax.f32 %v492_v44, 1.0  ;;  %vm493_vm13 = vcmp.gt.f32.partialorder %v492_v44, 0.0 }
 0x887   :  { %v1469_v49 = vmax.f32 %v1465_v46, 0.0  ;;  %2752 = vrcp.f32 %v494_v45 }
 0x889   :  { %v1470_v50 = vpack.c.bf16 %v1469_v49, %v1468_v48 }
 0x88b   :  { %2537 = vmatmul.mubr.bf16.vlgmr.msra.gmra.mrb[24].mxu0 %v1470_v50 }
 0x88c   :  { %2564 = vmatprep.mubr.msk.bf16.mxu0 %vm3319_vm1, %v3318_v7  ;;  %2549 = vmatpush3.bf16.msra.mxu0 %v2736_v17 }
 0x88d   :  { %2550 = vmatprep.subr.bf16.mxu0 %v3318_v7 }
 0x890   :  { %2551 = vmatpush3.bf16.msra.mxu0 %v2737_v18 }
 0x891   :  { %2552 = vmatprep.subr.bf16.mxu0 %v3318_v7  ;;  %v2753_v46 = vpop.eup %2752 }
 0x892   :  { %v497_v50 = vsel %vm493_vm13, %v2753_v46, 0.0 }
 0x894   :  { %2553 = vmatpush3.bf16.msra.mxu0 %v2738_v20 }
 0x895   :  { %2554 = vmatprep.subr.bf16.mxu0 %v3318_v7 }
 0x898   :  { %2555 = vmatpush3.bf16.msra.mxu0 %v2739_v21 }
 0x899   :  { %2556 = vmatprep.subr.bf16.mxu0 %v3318_v7 }
 0x89c   :  { %2557 = vmatpush3.bf16.msra.mxu0 %v2740_v22 }
 0x89d   :  { %2558 = vmatprep.subr.bf16.mxu0 %v3318_v7 }
 0x8a0   :  { %2559 = vmatpush3.bf16.msra.mxu0 %v2741_v24 }
 0x8a1   :  { %2560 = vmatprep.subr.bf16.mxu0 %v3318_v7 }
 0x8a4   :  { %2561 = vmatpush3.bf16.msra.mxu0 %v2742_v30 }
 0x8a5   :  { %2562 = vmatprep.subr.bf16.mxu0 %v3318_v7 }
 0x8a8   :  { %2563 = vmatpush3.bf16.msra.mxu0 %v2743_v31 }
 0x95e   :  { %v1576_v53 = vpop.f32.mrb[24].mxu0 }
 0x95f   :  { %v2538_v54 = vpop.f32.mrb[25].mxu0  ;;  %v1577_v57 = vadd.f32 %v2210_v52, %v1576_v53 }
 0x960   :  { %v1579_v55 = vpop.f32.mrb[26].mxu0  ;;  %v498_v54 = vmul.f32 %v2139_v33, %v497_v50 }
 0x961   :  { %v1580_v58 = vadd.f32 %v2210_v52, %v1579_v55  ;;  %v2539_v59 = vpop.f32.mrb[27].mxu0 }
 0x962   :  { %v2745_v59 = vld [vmem:[%s3475_s12 + $0x8] sm:$0xff]  }
 0x963   :  { %v1584_v60 = vpack.c.bf16 %v1580_v58, %v1577_v57  ;;  %v2744_v57 = vld [vmem:[%s3475_s12] sm:$0xff]   ;;  %v499_v58 = vpack.c.bf16 %v498_v54, %v498_v54 }
 0x965   :  { %v1586_v62 = vrot.slane %v1584_v60, 4  ;;  %v2746_v60 = vld [vmem:[%s3475_s12 + $0x10] sm:$0xff]  }
 0x967   :  { %v1589_v63 = vsel %vm851_vm8, %v3721_v61, %v1586_v62  ;;  %v1591_v1 = vsel %vm851_vm8, %v1586_v62, 0  ;;  %v2748_v62 = vld [vmem:[%s3475_s12 + $0x20] sm:$0xff]  }
 0x968   :  { %2541 = vmatpush3.bf16.msra.mxu1 %v1589_v63  ;;  %v2749_v63 = vld [vmem:[%s3475_s12 + $0x28] sm:$0xff]  }
 0x969   :  { %2542 = vmatprep.subr.bf16.mxu1 %v3318_v7 }
 0x96c   :  { %2543 = vmatpush3.bf16.msra.mxu1 %v1591_v1  ;;  %v2751_v1 = vld [vmem:[%s3475_s12 + $0x38] sm:$0xff]  }
 0x96d   :  { %2346 = vmatprep.subr.bf16.mxu1 %v2720_v0  ;;  %v2750_v0 = vld [vmem:[%s3475_s12 + $0x30] sm:$0xff]  }
 0x96f   :  { %2545 = vmatmul.mubr.msk.bf16.vlgmr.msra.gmra.mrb[20].mxu1 %vm856_vm10, %v3654_v19  ;;  %v2731_v19 = vld [vmem:[#allocation35 + $0x28] sm:$0xff]  }
 0x970   :  { %2347 = vmatpush3.bf16.msra.mxu1 %v2721_v2 }
 0x971   :  { %2348 = vmatprep.subr.bf16.mxu1 %v2722_v3 }
 0x974   :  { %2349 = vmatpush3.bf16.msra.mxu1 %v2723_v4 }
 0x975   :  { %2350 = vmatprep.subr.bf16.mxu1 %v2724_v23 }
 0x978   :  { %2351 = vmatpush3.bf16.msra.mxu1 %v2725_v6 }
 0x979   :  { %2352 = vmatprep.subr.bf16.mxu1 %v2726_v8  ;;  %v2247_v8 = vld [vmem:[#allocation2] ss:$0 sm:$0xff] }
 0x97c   :  { %2353 = vmatpush3.bf16.msra.mxu1 %v2727_v9 }
 0x97d   :  { %2354 = vmatprep.subr.bf16.mxu1 %v2728_v10 }
 0x980   :  { %2355 = vmatpush3.bf16.msra.mxu1 %v2729_v11 }
 0x981   :  { %2356 = vmatprep.subr.bf16.mxu1 %v2730_v12 }
 0x984   :  { %2357 = vmatpush3.bf16.msra.mxu1 %v2731_v19 }
 0x985   :  { %2358 = vmatprep.subr.bf16.mxu1 %v2732_v13 }
 0x988   :  { %2359 = vmatpush3.bf16.msra.mxu1 %v2733_v14 }
 0x989   :  { %2360 = vmatprep.subr.bf16.mxu1 %v2734_v15 }
 0x98c   :  { %2361 = vmatpush3.bf16.msra.mxu1 %v2735_v16 }
 0x98d   :  { %2568 = vmatprep.subr.bf16.mxu1 %v3318_v7 }
 0xa42   :  { %v1627_v25 = vpop.f32.mrb[20].mxu1 }
 0xa43   :  { %v1633_v26 = vpack.c.bf16 %v1627_v25, %v1627_v25  ;;  %v2546_v27 = vpop.f32.mrb[21].mxu1 }
 0xa44   :  { %v1630_v28 = vpop.f32.mrb[22].mxu1 }
 0xa45   :  { %v2547_v29 = vpop.f32.mrb[23].mxu1  ;;  %1801 = vmatprep.mubr.bf16.mxu1 %v1633_v26 }
 0xa46   :  { %1802 = vmatmul.mubr.bf16.vlgmr.msra.gmra.mrb[24].mxu1 %v3721_v61  ;;  %v2747_v61 = vld [vmem:[%s3475_s12 + $0x18] sm:$0xff]  }
 0xa47   :  { %2570 = vmatprep.mubr.msk.bf16.mxu1 %vm3319_vm1, %v3318_v7 }
 0xb19   :  { %v2362_v35 = vpop.f32.mrb[24].mxu1 }
 0xb1a   :  { %v2363_v37 = vpop.f32.mrb[25].mxu1 }
 0xb1b   :  { %v2364_v38 = vadd.f32 %v2363_v37, %v2362_v35  ;;  %v2365_v39 = vpop.f32.mrb[26].mxu1 }
 0xb1c   :  { %v2366_v40 = vpop.f32.mrb[27].mxu1 }
 0xb1d   :  { %v1804_v41 = vadd.f32 %v2364_v38, %v2220_v36 }
 0xb1f   :  { %v1809_v42 = vmax.f32 %v1804_v41, 0.0 }
 0xb21   :  { %v1810_v43 = vpack.c.bf16 %v1809_v42, %v1809_v42 }
 0xb23   :  { %2565 = vmatmul.mubr.bf16.vlgmr.msra.gmra.mrb[28].mxu0 %v1810_v43 }
 0xbf6   :  { %v1916_v47 = vpop.f32.mrb[28].mxu0 }
 0xbf7   :  { %v1917_v48 = vadd.f32 %v2237_v5, %v1916_v47  ;;  %v2566_v49 = vpop.f32.mrb[29].mxu0 }
 0xbf8   :  { %v1919_v51 = vpop.f32.mrb[30].mxu0 }
 0xbf9   :  { %v1922_v52 = vmax.f32 %v1917_v48, 0.0  ;;  %v2567_v53 = vpop.f32.mrb[31].mxu0 }
 0xbfb   :  { %v1923_v55 = vpack.c.bf16 %v1922_v52, %v1922_v52 }
 0xbfd   :  { %v1928_v56 = vsel %vm851_vm8, %v1923_v55, 0 }
 0xbfe   :  { %2569 = vmatpush3.bf16.msra.mxu1 %v1928_v56 }
 0xbff   :  { %2574 = vmatprep.subr.bf16.mxu1 %v3318_v7 }
 0xc01   :  { %2571 = vmatmul.mubr.msk.bf16.vlgmr.msra.gmra.mrb[28].mxu1 %vm478_vm9, %v499_v58 }
 0xc02   :  { %2575 = vmatpush3.bf16.msra.mxu1 %v2744_v57  ;;  %2590 = vmatprep.mubr.msk.bf16.mxu1 %vm3319_vm1, %v3318_v7 }
 0xc03   :  { %2576 = vmatprep.subr.bf16.mxu1 %v3318_v7 }
 0xc06   :  { %2577 = vmatpush3.bf16.msra.mxu1 %v2745_v59 }
 0xc07   :  { %2578 = vmatprep.subr.bf16.mxu1 %v3318_v7 }
 0xc0a   :  { %2579 = vmatpush3.bf16.msra.mxu1 %v2746_v60 }
 0xc0b   :  { %2580 = vmatprep.subr.bf16.mxu1 %v3318_v7 }
 0xc0e   :  { %2581 = vmatpush3.bf16.msra.mxu1 %v2747_v61 }
 0xc0f   :  { %2582 = vmatprep.subr.bf16.mxu1 %v3318_v7 }
 0xc12   :  { %2583 = vmatpush3.bf16.msra.mxu1 %v2748_v62 }
 0xc13   :  { %2584 = vmatprep.subr.bf16.mxu1 %v3318_v7 }
 0xc16   :  { %2585 = vmatpush3.bf16.msra.mxu1 %v2749_v63 }
 0xc17   :  { %2586 = vmatprep.subr.bf16.mxu1 %v3318_v7 }
 0xc1a   :  { %2587 = vmatpush3.bf16.msra.mxu1 %v2750_v0 }
 0xc1b   :  { %2588 = vmatprep.subr.bf16.mxu1 %v3318_v7 }
 0xc1e   :  { %2589 = vmatpush3.bf16.msra.mxu1 %v2751_v1 }
 0xcd4   :  { %v1964_v2 = vpop.f32.mrb[28].mxu1 }
 0xcd5   :  { %v1970_v3 = vpack.c.bf16 %v1964_v2, %v1964_v2  ;;  %v2572_v4 = vpop.f32.mrb[29].mxu1 }
 0xcd6   :  { %v1967_v23 = vpop.f32.mrb[30].mxu1 }
 0xcd7   :  { %v2573_v6 = vpop.f32.mrb[31].mxu1  ;;  %2591 = vmatmul.mubr.bf16.vlgmr.msra.gmra.mrb[32].mxu1 %v1970_v3 }
 0xdaa   :  { %v2076_v9 = vpop.f32.mrb[32].mxu1 }
 0xdab   :  { %v2077_v10 = vadd.f32 %v2247_v8, %v2076_v9  ;;  %v2592_v11 = vpop.f32.mrb[33].mxu1 }
 0xdac   :  { %v2079_v12 = vpop.f32.mrb[34].mxu1 }
 0xdad   :  { %2083 = vst.msk [vmem:[%s3483_s24] sm:$0x3] %vm2082_vm14, %v2077_v10  ;;  %v2593_v19 = vpop.f32.mrb[35].mxu1 }
 0xdae   :  { %2088 = vsyncpa [#allocation4], 1 }
 0xdaf   :  { %2089 = vsyncpa [#allocation6], 1 }
 0xdb0   :  { %2090 = vsyncpa [#allocation9], 1 }
 0xdb1   :  { %2091 = vsyncpa [#allocation12], 1 }
 0xdb2   :  { %2092 = vsyncpa [#allocation15], 1 }
 0xdb3   :  { %2093 = vsyncpa [#allocation18], 1 }
 0xdb4   :  { %2094 = vsyncpa [#allocation21], 1 }
 0xdb5   :  { %2095 = vsyncpa [#allocation24], 1 }
 0xdb6   :  { %2096 = vsyncpa [#allocation27], 1 }
 0xdb7   :  { %2097 = vsyncpa [#allocation30], 1 }
 0xdb8   :  { %2098 = vsyncpa [#allocation33], 1 }
 0xdb9   :  { %2099 = vsyncpa [#allocation36], 1 }

</bundles_post_ra>
